<compile_context>
chip_gen: v7x
topology: tpu7x:2x2x1
jax: 0.10.0
libtpu: 0.0.40
codegen_flags: <defaults>
</compile_context>

<pallas_src>
import numpy as np

import jax
import jax.numpy as jnp
from jax.experimental import pallas as pl
from jax.experimental.pallas import tpu as pltpu

LANE = 128


def _rup(n):
    return ((n + LANE - 1) // LANE) * LANE


def _row_tile(n, target=256):
    """Largest row tile <= target that divides n and is sublane-aligned (or full n)."""
    if n <= target:
        return n
    for t in range(target, 7, -8):
        if n % t == 0:
            return t
    return n


# ----------------------------- kernel helpers -----------------------------

def _elu(x):
    # ELU(alpha=1) in f32; clamp exp arg so the unselected branch never overflows.
    return jnp.where(x > 0, x, jnp.exp(jnp.minimum(x, 0.0)) - 1.0)


def _dot(a, b):
    # Cast the activation to the (possibly bf16) weight dtype; accumulate in f32 on the MXU.
    return jnp.dot(a.astype(b.dtype), b, preferred_element_type=jnp.float32)


def _make_hist_actor_critic_kernel(n_actor_rest, n_critic):
    """History encoder (4 block-weight matmuls) + actor backbone + critic, fully fused."""

    def kernel(*refs):
        obs_ref, cobs_ref = refs[0], refs[1]
        we, be, w1, b1, w2, b2, wo, bo = refs[2:10]
        wa_obs, wa_lat, ba0 = refs[10:13]
        a_wb = refs[13:13 + 2 * n_actor_rest]
        c_wb = refs[13 + 2 * n_actor_rest: 13 + 2 * n_actor_rest + 2 * n_critic]
        mean_ref, val_ref = refs[-2], refs[-1]

        obs = obs_ref[...]

        # ---- state-history encoder as plain matmuls on block-structured weights ----
        h = _elu(_dot(obs, we[...]) + be[...])        # per-timestep linear   (N, pad(T*30))
        h = _elu(_dot(h, w1[...]) + b1[...])          # conv1 (k=4, s=2)      (N, pad(L1*20))
        h = _elu(_dot(h, w2[...]) + b2[...])          # conv2 (k=2, s=1)      (N, pad(L2*10))
        latent = _elu(_dot(h, wo[...]) + bo[...])     # flatten + out linear  (N, pad(latent))

        # ---- actor backbone, first layer split obs-part / latent-part (no concat) ----
        h = _elu(_dot(obs, wa_obs[...]) + _dot(latent, wa_lat[...]) + ba0[...])
        for i in range(n_actor_rest):
            h = _dot(h, a_wb[2 * i][...]) + a_wb[2 * i + 1][...]
            if i < n_actor_rest - 1:
                h = _elu(h)
        mean_ref[...] = h                             # (N, pad(num_actions)), lane-dense

        # ---- critic ----
        c = cobs_ref[...]
        for i in range(n_critic):
            c = _dot(c, c_wb[2 * i][...]) + c_wb[2 * i + 1][...]
            if i < n_critic - 1:
                c = _elu(c)
        val_ref[...] = c                              # (N, pad(1)), lane-dense

    return kernel


def _make_priv_actor_critic_kernel(n_priv, n_actor_rest, n_critic):
    """Priv-info encoder MLP (first layer embedded into full-obs weight) + actor + critic."""

    def kernel(*refs):
        obs_ref, cobs_ref = refs[0], refs[1]
        p_wb = refs[2:2 + 2 * n_priv]
        base = 2 + 2 * n_priv
        wa_obs, wa_lat, ba0 = refs[base:base + 3]
        a_wb = refs[base + 3: base + 3 + 2 * n_actor_rest]
        c_wb = refs[base + 3 + 2 * n_actor_rest: base + 3 + 2 * n_actor_rest + 2 * n_critic]
        mean_ref, val_ref = refs[-2], refs[-1]

        obs = obs_ref[...]

        # ---- priv-info encoder (first layer picks the priv columns via zero rows) ----
        h = obs
        for i in range(n_priv):
            h = _elu(_dot(h, p_wb[2 * i][...]) + p_wb[2 * i + 1][...])
        latent = h

        # ---- actor backbone ----
        h = _elu(_dot(obs, wa_obs[...]) + _dot(latent, wa_lat[...]) + ba0[...])
        for i in range(n_actor_rest):
            h = _dot(h, a_wb[2 * i][...]) + a_wb[2 * i + 1][...]
            if i < n_actor_rest - 1:
                h = _elu(h)
        mean_ref[...] = h

        # ---- critic ----
        c = cobs_ref[...]
        for i in range(n_critic):
            c = _dot(c, c_wb[2 * i][...]) + c_wb[2 * i + 1][...]
            if i < n_critic - 1:
                c = _elu(c)
        val_ref[...] = c

    return kernel


# ------------------------ parameter initialization ------------------------

def _init_linear(key, in_dim, out_dim, scale=0.1):
    kw, kb = jax.random.split(key)
    w = scale * jax.random.normal(kw, (in_dim, out_dim), jnp.float32)
    b = scale * jax.random.normal(kb, (out_dim,), jnp.float32)
    return w, b


def init_params(key, *, num_prop, num_priv_info, num_priv_explicit, num_history,
                num_critic_obs, num_actions, actor_hidden_dims, critic_hidden_dims,
                priv_encoder_dims, init_noise_std=1.0):
    assert num_history == 10, "this config packs the history_tsteps == 10 conv stack"
    assert len(priv_encoder_dims) > 0 and len(actor_hidden_dims) > 0
    channel_size = 10
    keys = jax.random.split(key, 32)
    ki = iter(keys)
    p = {}

    # priv-info encoder MLP
    dims = [num_priv_info] + list(priv_encoder_dims)
    p["priv_enc"] = [_init_linear(next(ki), dims[i], dims[i + 1]) for i in range(len(dims) - 1)]
    priv_latent_dim = priv_encoder_dims[-1]

    # state-history encoder (tsteps == 10)
    p["hist_enc_lin"] = _init_linear(next(ki), num_prop, 3 * channel_size)
    kw, kb = jax.random.split(next(ki))
    p["hist_conv1_w"] = 0.1 * jax.random.normal(kw, (2 * channel_size, 3 * channel_size, 4), jnp.float32)
    p["hist_conv1_b"] = 0.1 * jax.random.normal(kb, (2 * channel_size,), jnp.float32)
    kw, kb = jax.random.split(next(ki))
    p["hist_conv2_w"] = 0.1 * jax.random.normal(kw, (channel_size, 2 * channel_size, 2), jnp.float32)
    p["hist_conv2_b"] = 0.1 * jax.random.normal(kb, (channel_size,), jnp.float32)
    p["hist_out_lin"] = _init_linear(next(ki), channel_size * 3, priv_latent_dim)

    # actor backbone
    a_dims = [num_prop + num_priv_explicit + priv_latent_dim] + list(actor_hidden_dims) + [num_actions]
    p["actor"] = [_init_linear(next(ki), a_dims[i], a_dims[i + 1]) for i in range(len(a_dims) - 1)]

    # critic
    c_dims = [num_critic_obs] + list(critic_hidden_dims) + [1]
    p["critic"] = [_init_linear(next(ki), c_dims[i], c_dims[i + 1]) for i in range(len(c_dims) - 1)]

    p["action_std"] = init_noise_std * jnp.ones((num_actions,), jnp.float32)

    cfg = dict(num_prop=num_prop, num_priv_info=num_priv_info,
               num_priv_explicit=num_priv_explicit, num_history=num_history,
               channel_size=channel_size, priv_latent_dim=priv_latent_dim,
               num_actions=num_actions, num_critic_obs=num_critic_obs,
               actor_hidden_dims=list(actor_hidden_dims),
               critic_hidden_dims=list(critic_hidden_dims),
               priv_encoder_dims=list(priv_encoder_dims))
    return p, cfg


# --------------------- one-time packing (hoisted prep) ---------------------

def pack_params(params, cfg, compute_dtype=jnp.bfloat16):
    """Build batch-independent, lane-padded, block-structured weights once (host side)."""
    f32 = jnp.float32
    P, T, ch = cfg["num_prop"], cfg["num_history"], cfg["channel_size"]
    NPE, NPI = cfg["num_priv_explicit"], cfg["num_priv_info"]
    latent = cfg["priv_latent_dim"]
    n_front = P + NPE
    obs_dim = P + NPE + NPI + T * P
    K1, S1, K2, S2 = 4, 2, 2, 1
    L1 = (T - K1) // S1 + 1
    L2 = (L1 - K2) // S2 + 1
    C3, C2 = 3 * ch, 2 * ch

    def g(x):
        return np.asarray(jax.device_get(x), np.float32)

    def pad2(a, rows, cols):
        a = np.asarray(a, np.float32)
        out = np.zeros((rows, cols), np.float32)
        out[:a.shape[0], :a.shape[1]] = a
        return out

    def as_w(a):
        return jnp.asarray(a, compute_dtype)

    def as_b(a):
        return jnp.asarray(a, f32)

    d_proj, d_y1, d_y2 = T * C3, L1 * C2, L2 * ch
    p_proj, p_y1, p_y2, p_lat = _rup(d_proj), _rup(d_y1), _rup(d_y2), _rup(latent)

    # ---- history encoder folded into block-structured matrices ----
    we, be = g(params["hist_enc_lin"][0]), g(params["hist_enc_lin"][1])
    W1, b1 = g(params["hist_conv1_w"]), g(params["hist_conv1_b"])   # (2ch, 3ch, K1)
    W2, b2 = g(params["hist_conv2_w"]), g(params["hist_conv2_b"])   # (ch, 2ch, K2)
    Wo, bo = g(params["hist_out_lin"][0]), g(params["hist_out_lin"][1])

    # per-timestep linear: block-diagonal, embedded at the history columns of the full obs
    we_full = np.zeros((obs_dim, d_proj), np.float32)
    off = obs_dim - T * P
    for t in range(T):
        we_full[off + t * P: off + (t + 1) * P, t * C3:(t + 1) * C3] = we
    be_t = np.tile(be, T)[None, :]

    # conv1 (NCW, channels = 30 features, width = T): banded weight
    w1_blk = np.zeros((d_proj, d_y1), np.float32)
    for t in range(L1):
        for k in range(K1):
            src = S1 * t + k
            w1_blk[src * C3:(src + 1) * C3, t * C2:(t + 1) * C2] = W1[:, :, k].T
    b1_t = np.tile(b1, L1)[None, :]

    # conv2
    w2_blk = np.zeros((d_y1, d_y2), np.float32)
    for t in range(L2):
        for k in range(K2):
            src = S2 * t + k
            w2_blk[src * C2:(src + 1) * C2, t * ch:(t + 1) * ch] = W2[:, :, k].T
    b2_t = np.tile(b2, L2)[None, :]

    # torch Flatten is channel-major: fold it as a row permutation of the output weight
    wo_perm = np.zeros((d_y2, latent), np.float32)
    for c in range(ch):
        for l in range(L2):
            wo_perm[l * ch + c, :] = Wo[c * L2 + l, :]
    bo_t = bo[None, :]

    hist_w = (as_w(pad2(we_full, obs_dim, p_proj)), as_b(pad2(be_t, 1, p_proj)),
              as_w(pad2(w1_blk, p_proj, p_y1)),     as_b(pad2(b1_t, 1, p_y1)),
              as_w(pad2(w2_blk, p_y1, p_y2)),       as_b(pad2(b2_t, 1, p_y2)),
              as_w(pad2(wo_perm, p_y2, p_lat)),     as_b(pad2(bo_t, 1, p_lat)))

    # ---- priv-info encoder: first layer embedded into the full-obs columns ----
    priv_w = []
    prev_pad = obs_dim
    for i, (w, b) in enumerate(params["priv_enc"]):
        w, b = g(w), g(b)
        out_pad = _rup(w.shape[1])
        if i == 0:
            wfull = np.zeros((obs_dim, w.shape[1]), np.float32)
            wfull[n_front:n_front + NPI, :] = w
            priv_w.append(as_w(pad2(wfull, obs_dim, out_pad)))
        else:
            priv_w.append(as_w(pad2(w, prev_pad, out_pad)))
        priv_w.append(as_b(pad2(b[None, :], 1, out_pad)))
        prev_pad = out_pad
    priv_w = tuple(priv_w)

    # ---- actor backbone: first layer split (obs-part over full obs, latent-part) ----
    aw = [(g(w), g(b)) for (w, b) in params["actor"]]
    w0, b0 = aw[0]
    h0_pad = _rup(w0.shape[1])
    wa_obs = np.zeros((obs_dim, w0.shape[1]), np.float32)
    wa_obs[:n_front, :] = w0[:n_front, :]
    actor_first = (as_w(pad2(wa_obs, obs_dim, h0_pad)),
                   as_w(pad2(w0[n_front:, :], p_lat, h0_pad)),
                   as_b(pad2(b0[None, :], 1, h0_pad)))
    actor_rest = []
    prev_pad = h0_pad
    for (w, b) in aw[1:]:
        out_pad = _rup(w.shape[1])
        actor_rest += [as_w(pad2(w, prev_pad, out_pad)), as_b(pad2(b[None, :], 1, out_pad))]
        prev_pad = out_pad
    actor_rest = tuple(actor_rest)

    # ---- critic ----
    cw = [(g(w), g(b)) for (w, b) in params["critic"]]
    critic = []
    prev_pad = cw[0][0].shape[0]    # critic_obs width, unpadded input
    for (w, b) in cw:
        out_pad = _rup(w.shape[1])
        critic += [as_w(pad2(w, prev_pad, out_pad)), as_b(pad2(b[None, :], 1, out_pad))]
        prev_pad = out_pad
    critic = tuple(critic)

    return {"hist_w": hist_w, "priv_w": priv_w, "actor_first": actor_first,
            "actor_rest": actor_rest, "critic": critic,
            "action_std": params["action_std"].astype(f32)}


# ------------------------------ forward pass -------------------------------

def build_forward_fns(cfg):
    num_actions = cfg["num_actions"]
    n_priv = len(cfg["priv_encoder_dims"])
    n_actor_rest = len(cfg["actor_hidden_dims"])            # layers after the first
    n_critic = len(cfg["critic_hidden_dims"]) + 1
    mean_pad = _rup(num_actions)
    val_pad = _rup(1)

    # kernels built once (not per call)
    hist_kernel = _make_hist_actor_critic_kernel(n_actor_rest, n_critic)
    priv_kernel = _make_priv_actor_critic_kernel(n_priv, n_actor_rest, n_critic)

    def _call(kernel, obs, cobs, weights):
        N, obs_w = obs.shape
        cobs_w = cobs.shape[1]
        tile = _row_tile(N)
        grid = (N // tile,)

        def rows(i):
            return (i, 0)

        def fixed(i):
            return (0, 0)

        in_specs = ([pl.BlockSpec((tile, obs_w), rows),
                     pl.BlockSpec((tile, cobs_w), rows)]
                    + [pl.BlockSpec(w.shape, fixed) for w in weights])
        out_specs = [pl.BlockSpec((tile, mean_pad), rows),
                     pl.BlockSpec((tile, val_pad), rows)]
        out_shape = [jax.ShapeDtypeStruct((N, mean_pad), jnp.float32),
                     jax.ShapeDtypeStruct((N, val_pad), jnp.float32)]
        return pl.pallas_call(
            kernel,
            grid_spec=pltpu.PrefetchScalarGridSpec(
                num_scalar_prefetch=0, grid=grid,
                in_specs=in_specs, out_specs=out_specs),
            out_shape=out_shape,
            compiler_params=pltpu.CompilerParams(
                dimension_semantics=("parallel",)),
        )(obs, cobs, *weights)

    @jax.jit
    def forward_hist(packed, obs, critic_obs):
        cdt = packed["hist_w"][0].dtype
        weights = (packed["hist_w"] + packed["actor_first"]
                   + packed["actor_rest"] + packed["critic"])
        mean_p, val_p = _call(hist_kernel, obs.astype(cdt), critic_obs.astype(cdt), weights)
        mean = mean_p[:, :num_actions]
        std = jnp.broadcast_to(packed["action_std"][None, :], mean.shape)
        return mean, std, val_p[:, :1]

    @jax.jit
    def forward_priv(packed, obs, critic_obs):
        cdt = packed["priv_w"][0].dtype
        weights = (packed["priv_w"] + packed["actor_first"]
                   + packed["actor_rest"] + packed["critic"])
        mean_p, val_p = _call(priv_kernel, obs.astype(cdt), critic_obs.astype(cdt), weights)
        mean = mean_p[:, :num_actions]
        std = jnp.broadcast_to(packed["action_std"][None, :], mean.shape)
        return mean, std, val_p[:, :1]

    return {"hist": forward_hist, "priv": forward_priv}


# --------------------------- pure-JAX reference -----------------------------

def reference_forward(params, cfg, obs, use_hist):
    """Direct (non-Pallas) re-implementation of the PyTorch module for validation."""
    def elu(x):
        return jnp.where(x > 0, x, jnp.exp(jnp.minimum(x, 0.0)) - 1.0)

    P, NPE, NPI = cfg["num_prop"], cfg["num_priv_explicit"], cfg["num_priv_info"]
    T, ch = cfg["num_history"], cfg["channel_size"]
    N = obs.shape[0]

    if use_hist:
        hist = obs[:, -T * P:].reshape(N, T, P)
        we, be = params["hist_enc_lin"]
        proj = elu(hist.reshape(N * T, P) @ we + be)
        x = proj.reshape(N, T, 3 * ch).transpose(0, 2, 1)            # (N, 30, T) NCW
        W1, b1 = params["hist_conv1_w"], params["hist_conv1_b"]
        L1 = (T - 4) // 2 + 1
        y1 = elu(jnp.stack([jnp.einsum("nck,ock->no", x[:, :, 2 * t:2 * t + 4], W1) + b1
                            for t in range(L1)], axis=2))
        W2, b2 = params["hist_conv2_w"], params["hist_conv2_b"]
        L2 = L1 - 1
        y2 = elu(jnp.stack([jnp.einsum("nck,ock->no", y1[:, :, t:t + 2], W2) + b2
                            for t in range(L2)], axis=2))
        flat = y2.reshape(N, ch * L2)                                # channel-major Flatten
        wo, bo = params["hist_out_lin"]
        latent = elu(flat @ wo + bo)
    else:
        h = obs[:, P + NPE: P + NPE + NPI]
        for w, b in params["priv_enc"]:
            h = elu(h @ w + b)
        latent = h

    h = jnp.concatenate([obs[:, :P + NPE], latent], axis=1)
    aw = params["actor"]
    for i, (w, b) in enumerate(aw):
        h = h @ w + b
        if i < len(aw) - 1:
            h = elu(h)
    return h


def reference_critic(params, critic_obs):
    def elu(x):
        return jnp.where(x > 0, x, jnp.exp(jnp.minimum(x, 0.0)) - 1.0)
    h = critic_obs
    cw = params["critic"]
    for i, (w, b) in enumerate(cw):
        h = h @ w + b
        if i < len(cw) - 1:
            h = elu(h)
    return h


# ---------------------------------- main -----------------------------------

if __name__ == "__main__":
    num_prop = 16
    num_priv_info = 9
    num_priv_explicit = 3
    num_history = 10
    num_critic_obs = 32
    num_actions = 4
    actor_hidden_dims = [32, 32, 32]
    critic_hidden_dims = [32, 32, 32]
    priv_encoder_dims = [16, 8]

    key = jax.random.PRNGKey(0)
    kp, ko, kc = jax.random.split(key, 3)

    params, cfg = init_params(
        kp,
        num_prop=num_prop, num_priv_info=num_priv_info,
        num_priv_explicit=num_priv_explicit, num_history=num_history,
        num_critic_obs=num_critic_obs, num_actions=num_actions,
        actor_hidden_dims=actor_hidden_dims, critic_hidden_dims=critic_hidden_dims,
        priv_encoder_dims=priv_encoder_dims)

    batch = 2
    obs_dim = num_prop + num_priv_explicit + num_priv_info + num_history * num_prop
    obs = jax.random.normal(ko, (batch, obs_dim), jnp.float32)
    critic_obs = jax.random.normal(kc, (batch, num_critic_obs), jnp.float32)

    fns = build_forward_fns(cfg)

    # ---- f32-packed weights: strict numerical check against the pure-JAX reference ----
    packed_f32 = pack_params(params, cfg, compute_dtype=jnp.float32)
    mean_h, std_h, val_h = fns["hist"](packed_f32, obs, critic_obs)
    mean_p, std_p, val_p = fns["priv"](packed_f32, obs, critic_obs)
    jax.block_until_ready((mean_h, std_h, val_h, mean_p, std_p, val_p))

    assert mean_h.shape == (batch, num_actions) and mean_p.shape == (batch, num_actions)
    assert std_h.shape == (batch, num_actions) and std_p.shape == (batch, num_actions)
    assert val_h.shape == (batch, 1) and val_p.shape == (batch, 1)
    assert bool(jnp.all(jnp.isfinite(mean_h))) and bool(jnp.all(jnp.isfinite(mean_p)))
    assert bool(jnp.all(jnp.isfinite(val_h)))

    ref_h = reference_forward(params, cfg, obs, use_hist=True)
    ref_p = reference_forward(params, cfg, obs, use_hist=False)
    ref_v = reference_critic(params, critic_obs)
    assert float(jnp.max(jnp.abs(mean_h - ref_h))) < 1e-3
    assert float(jnp.max(jnp.abs(mean_p - ref_p))) < 1e-3
    assert float(jnp.max(jnp.abs(val_h - ref_v))) < 1e-3
    assert float(jnp.max(jnp.abs(val_p - ref_v))) < 1e-3

    # ---- default bf16-packed weights (fast MXU path on v5e/v6e/v7x): looser tolerance ----
    packed_bf16 = pack_params(params, cfg)      # compute_dtype = bfloat16
    mean_hb, std_hb, val_hb = fns["hist"](packed_bf16, obs, critic_obs)
    mean_pb, std_pb, val_pb = fns["priv"](packed_bf16, obs, critic_obs)
    jax.block_until_ready((mean_hb, std_hb, val_hb, mean_pb, std_pb, val_pb))
    assert bool(jnp.all(jnp.isfinite(mean_hb))) and bool(jnp.all(jnp.isfinite(val_hb)))
    assert float(jnp.max(jnp.abs(mean_hb - ref_h))) < 1e-1
    assert float(jnp.max(jnp.abs(mean_pb - ref_p))) < 1e-1
    assert float(jnp.max(jnp.abs(val_hb - ref_v))) < 1e-1

    print("KERNEL_OK")
</pallas_src>

<mosaic_0001>
module attributes {stable_mosaic.version = 11 : i64} {
  func.func @kernel(%arg0: i32, %arg1: memref<2x188xf32, #tpu.memory_space<vmem>>, %arg2: memref<2x32xf32, #tpu.memory_space<vmem>>, %arg3: memref<188x384xf32, #tpu.memory_space<vmem>>, %arg4: memref<1x384xf32, #tpu.memory_space<vmem>>, %arg5: memref<384x128xf32, #tpu.memory_space<vmem>>, %arg6: memref<1x128xf32, #tpu.memory_space<vmem>>, %arg7: memref<128x128xf32, #tpu.memory_space<vmem>>, %arg8: memref<1x128xf32, #tpu.memory_space<vmem>>, %arg9: memref<128x128xf32, #tpu.memory_space<vmem>>, %arg10: memref<1x128xf32, #tpu.memory_space<vmem>>, %arg11: memref<188x128xf32, #tpu.memory_space<vmem>>, %arg12: memref<128x128xf32, #tpu.memory_space<vmem>>, %arg13: memref<1x128xf32, #tpu.memory_space<vmem>>, %arg14: memref<128x128xf32, #tpu.memory_space<vmem>>, %arg15: memref<1x128xf32, #tpu.memory_space<vmem>>, %arg16: memref<128x128xf32, #tpu.memory_space<vmem>>, %arg17: memref<1x128xf32, #tpu.memory_space<vmem>>, %arg18: memref<128x128xf32, #tpu.memory_space<vmem>>, %arg19: memref<1x128xf32, #tpu.memory_space<vmem>>, %arg20: memref<32x128xf32, #tpu.memory_space<vmem>>, %arg21: memref<1x128xf32, #tpu.memory_space<vmem>>, %arg22: memref<128x128xf32, #tpu.memory_space<vmem>>, %arg23: memref<1x128xf32, #tpu.memory_space<vmem>>, %arg24: memref<128x128xf32, #tpu.memory_space<vmem>>, %arg25: memref<1x128xf32, #tpu.memory_space<vmem>>, %arg26: memref<128x128xf32, #tpu.memory_space<vmem>>, %arg27: memref<1x128xf32, #tpu.memory_space<vmem>>, %arg28: memref<2x128xf32, #tpu.memory_space<vmem>>, %arg29: memref<2x128xf32, #tpu.memory_space<vmem>>) attributes {dimension_semantics = [#tpu.dimension_semantics<parallel>], iteration_bounds = array<i64: 1>, scalar_prefetch = 0 : i64, scratch_operands = 0 : i64, tpu.core_type = #tpu.core_type<tc>, window_params = [{transform_indices = @transform_0, window_bounds = array<i64: 2, 188>}, {transform_indices = @transform_1, window_bounds = array<i64: 2, 32>}, {pipeline_mode = #tpu.pipeline_mode<synchronous>, transform_indices = @transform_2, window_bounds = array<i64: 188, 384>}, {pipeline_mode = #tpu.pipeline_mode<synchronous>, transform_indices = @transform_3, window_bounds = array<i64: 1, 384>}, {pipeline_mode = #tpu.pipeline_mode<synchronous>, transform_indices = @transform_4, window_bounds = array<i64: 384, 128>}, {pipeline_mode = #tpu.pipeline_mode<synchronous>, transform_indices = @transform_5, window_bounds = array<i64: 1, 128>}, {pipeline_mode = #tpu.pipeline_mode<synchronous>, transform_indices = @transform_6, window_bounds = array<i64: 128, 128>}, {pipeline_mode = #tpu.pipeline_mode<synchronous>, transform_indices = @transform_7, window_bounds = array<i64: 1, 128>}, {pipeline_mode = #tpu.pipeline_mode<synchronous>, transform_indices = @transform_8, window_bounds = array<i64: 128, 128>}, {pipeline_mode = #tpu.pipeline_mode<synchronous>, transform_indices = @transform_9, window_bounds = array<i64: 1, 128>}, {pipeline_mode = #tpu.pipeline_mode<synchronous>, transform_indices = @transform_10, window_bounds = array<i64: 188, 128>}, {pipeline_mode = #tpu.pipeline_mode<synchronous>, transform_indices = @transform_11, window_bounds = array<i64: 128, 128>}, {pipeline_mode = #tpu.pipeline_mode<synchronous>, transform_indices = @transform_12, window_bounds = array<i64: 1, 128>}, {pipeline_mode = #tpu.pipeline_mode<synchronous>, transform_indices = @transform_13, window_bounds = array<i64: 128, 128>}, {pipeline_mode = #tpu.pipeline_mode<synchronous>, transform_indices = @transform_14, window_bounds = array<i64: 1, 128>}, {pipeline_mode = #tpu.pipeline_mode<synchronous>, transform_indices = @transform_15, window_bounds = array<i64: 128, 128>}, {pipeline_mode = #tpu.pipeline_mode<synchronous>, transform_indices = @transform_16, window_bounds = array<i64: 1, 128>}, {pipeline_mode = #tpu.pipeline_mode<synchronous>, transform_indices = @transform_17, window_bounds = array<i64: 128, 128>}, {pipeline_mode = #tpu.pipeline_mode<synchronous>, transform_indices = @transform_18, window_bounds = array<i64: 1, 128>}, {pipeline_mode = #tpu.pipeline_mode<synchronous>, transform_indices = @transform_19, window_bounds = array<i64: 32, 128>}, {pipeline_mode = #tpu.pipeline_mode<synchronous>, transform_indices = @transform_20, window_bounds = array<i64: 1, 128>}, {pipeline_mode = #tpu.pipeline_mode<synchronous>, transform_indices = @transform_21, window_bounds = array<i64: 128, 128>}, {pipeline_mode = #tpu.pipeline_mode<synchronous>, transform_indices = @transform_22, window_bounds = array<i64: 1, 128>}, {pipeline_mode = #tpu.pipeline_mode<synchronous>, transform_indices = @transform_23, window_bounds = array<i64: 128, 128>}, {pipeline_mode = #tpu.pipeline_mode<synchronous>, transform_indices = @transform_24, window_bounds = array<i64: 1, 128>}, {pipeline_mode = #tpu.pipeline_mode<synchronous>, transform_indices = @transform_25, window_bounds = array<i64: 128, 128>}, {pipeline_mode = #tpu.pipeline_mode<synchronous>, transform_indices = @transform_26, window_bounds = array<i64: 1, 128>}, {transform_indices = @transform_27, window_bounds = array<i64: 2, 128>}, {transform_indices = @transform_28, window_bounds = array<i64: 2, 128>}]} {
    %c0 = arith.constant 0 : index
    %c0_0 = arith.constant 0 : index
    %0 = vector.load %arg1[%c0, %c0_0] : memref<2x188xf32, #tpu.memory_space<vmem>>, vector<2x188xf32>
    %c0_1 = arith.constant 0 : index
    %c0_2 = arith.constant 0 : index
    %1 = vector.load %arg3[%c0_1, %c0_2] : memref<188x384xf32, #tpu.memory_space<vmem>>, vector<188x384xf32>
    %cst = arith.constant dense<0.000000e+00> : vector<2x384xf32>
    %2 = tpu.matmul %0, %1, %cst {dimension_numbers = #tpu.dot_dimension_numbers<[1], [0], [0], [1], [0, 0, 1, 1], [], []>} : vector<2x188xf32>, vector<188x384xf32>, vector<2x384xf32> -> vector<2x384xf32>
    %c0_3 = arith.constant 0 : index
    %c0_4 = arith.constant 0 : index
    %3 = vector.load %arg4[%c0_3, %c0_4] : memref<1x384xf32, #tpu.memory_space<vmem>>, vector<1x384xf32>
    %4 = vector.broadcast %3 : vector<1x384xf32> to vector<2x384xf32>
    %5 = arith.addf %2, %4 : vector<2x384xf32>
    %cst_5 = arith.constant 0.000000e+00 : f32
    %6 = vector.broadcast %cst_5 : f32 to vector<2x384xf32>
    %7 = arith.cmpf ogt, %5, %6 : vector<2x384xf32>
    %cst_6 = arith.constant 0.000000e+00 : f32
    %8 = vector.broadcast %cst_6 : f32 to vector<2x384xf32>
    %9 = arith.minimumf %5, %8 : vector<2x384xf32>
    %10 = math.exp %9 : vector<2x384xf32>
    %cst_7 = arith.constant 1.000000e+00 : f32
    %11 = vector.broadcast %cst_7 : f32 to vector<2x384xf32>
    %12 = arith.subf %10, %11 : vector<2x384xf32>
    %13 = arith.select %7, %5, %12 : vector<2x384xi1>, vector<2x384xf32>
    %c0_8 = arith.constant 0 : index
    %c0_9 = arith.constant 0 : index
    %14 = vector.load %arg5[%c0_8, %c0_9] : memref<384x128xf32, #tpu.memory_space<vmem>>, vector<384x128xf32>
    %cst_10 = arith.constant dense<0.000000e+00> : vector<2x128xf32>
    %15 = tpu.matmul %13, %14, %cst_10 {dimension_numbers = #tpu.dot_dimension_numbers<[1], [0], [0], [1], [0, 0, 1, 1], [], []>} : vector<2x384xf32>, vector<384x128xf32>, vector<2x128xf32> -> vector<2x128xf32>
    %c0_11 = arith.constant 0 : index
    %c0_12 = arith.constant 0 : index
    %16 = vector.load %arg6[%c0_11, %c0_12] : memref<1x128xf32, #tpu.memory_space<vmem>>, vector<1x128xf32>
    %17 = vector.broadcast %16 : vector<1x128xf32> to vector<2x128xf32>
    %18 = arith.addf %15, %17 : vector<2x128xf32>
    %cst_13 = arith.constant 0.000000e+00 : f32
    %19 = vector.broadcast %cst_13 : f32 to vector<2x128xf32>
    %20 = arith.cmpf ogt, %18, %19 : vector<2x128xf32>
    %cst_14 = arith.constant 0.000000e+00 : f32
    %21 = vector.broadcast %cst_14 : f32 to vector<2x128xf32>
    %22 = arith.minimumf %18, %21 : vector<2x128xf32>
    %23 = math.exp %22 : vector<2x128xf32>
    %cst_15 = arith.constant 1.000000e+00 : f32
    %24 = vector.broadcast %cst_15 : f32 to vector<2x128xf32>
    %25 = arith.subf %23, %24 : vector<2x128xf32>
    %26 = arith.select %20, %18, %25 : vector<2x128xi1>, vector<2x128xf32>
    %c0_16 = arith.constant 0 : index
    %c0_17 = arith.constant 0 : index
    %27 = vector.load %arg7[%c0_16, %c0_17] : memref<128x128xf32, #tpu.memory_space<vmem>>, vector<128x128xf32>
    %cst_18 = arith.constant dense<0.000000e+00> : vector<2x128xf32>
    %28 = tpu.matmul %26, %27, %cst_18 {dimension_numbers = #tpu.dot_dimension_numbers<[1], [0], [0], [1], [0, 0, 1, 1], [], []>} : vector<2x128xf32>, vector<128x128xf32>, vector<2x128xf32> -> vector<2x128xf32>
    %c0_19 = arith.constant 0 : index
    %c0_20 = arith.constant 0 : index
    %29 = vector.load %arg8[%c0_19, %c0_20] : memref<1x128xf32, #tpu.memory_space<vmem>>, vector<1x128xf32>
    %30 = vector.broadcast %29 : vector<1x128xf32> to vector<2x128xf32>
    %31 = arith.addf %28, %30 : vector<2x128xf32>
    %cst_21 = arith.constant 0.000000e+00 : f32
    %32 = vector.broadcast %cst_21 : f32 to vector<2x128xf32>
    %33 = arith.cmpf ogt, %31, %32 : vector<2x128xf32>
    %cst_22 = arith.constant 0.000000e+00 : f32
    %34 = vector.broadcast %cst_22 : f32 to vector<2x128xf32>
    %35 = arith.minimumf %31, %34 : vector<2x128xf32>
    %36 = math.exp %35 : vector<2x128xf32>
    %cst_23 = arith.constant 1.000000e+00 : f32
    %37 = vector.broadcast %cst_23 : f32 to vector<2x128xf32>
    %38 = arith.subf %36, %37 : vector<2x128xf32>
    %39 = arith.select %33, %31, %38 : vector<2x128xi1>, vector<2x128xf32>
    %c0_24 = arith.constant 0 : index
    %c0_25 = arith.constant 0 : index
    %40 = vector.load %arg9[%c0_24, %c0_25] : memref<128x128xf32, #tpu.memory_space<vmem>>, vector<128x128xf32>
    %cst_26 = arith.constant dense<0.000000e+00> : vector<2x128xf32>
    %41 = tpu.matmul %39, %40, %cst_26 {dimension_numbers = #tpu.dot_dimension_numbers<[1], [0], [0], [1], [0, 0, 1, 1], [], []>} : vector<2x128xf32>, vector<128x128xf32>, vector<2x128xf32> -> vector<2x128xf32>
    %c0_27 = arith.constant 0 : index
    %c0_28 = arith.constant 0 : index
    %42 = vector.load %arg10[%c0_27, %c0_28] : memref<1x128xf32, #tpu.memory_space<vmem>>, vector<1x128xf32>
    %43 = vector.broadcast %42 : vector<1x128xf32> to vector<2x128xf32>
    %44 = arith.addf %41, %43 : vector<2x128xf32>
    %cst_29 = arith.constant 0.000000e+00 : f32
    %45 = vector.broadcast %cst_29 : f32 to vector<2x128xf32>
    %46 = arith.cmpf ogt, %44, %45 : vector<2x128xf32>
    %cst_30 = arith.constant 0.000000e+00 : f32
    %47 = vector.broadcast %cst_30 : f32 to vector<2x128xf32>
    %48 = arith.minimumf %44, %47 : vector<2x128xf32>
    %49 = math.exp %48 : vector<2x128xf32>
    %cst_31 = arith.constant 1.000000e+00 : f32
    %50 = vector.broadcast %cst_31 : f32 to vector<2x128xf32>
    %51 = arith.subf %49, %50 : vector<2x128xf32>
    %52 = arith.select %46, %44, %51 : vector<2x128xi1>, vector<2x128xf32>
    %c0_32 = arith.constant 0 : index
    %c0_33 = arith.constant 0 : index
    %53 = vector.load %arg11[%c0_32, %c0_33] : memref<188x128xf32, #tpu.memory_space<vmem>>, vector<188x128xf32>
    %cst_34 = arith.constant dense<0.000000e+00> : vector<2x128xf32>
    %54 = tpu.matmul %0, %53, %cst_34 {dimension_numbers = #tpu.dot_dimension_numbers<[1], [0], [0], [1], [0, 0, 1, 1], [], []>} : vector<2x188xf32>, vector<188x128xf32>, vector<2x128xf32> -> vector<2x128xf32>
    %c0_35 = arith.constant 0 : index
    %c0_36 = arith.constant 0 : index
    %55 = vector.load %arg12[%c0_35, %c0_36] : memref<128x128xf32, #tpu.memory_space<vmem>>, vector<128x128xf32>
    %cst_37 = arith.constant dense<0.000000e+00> : vector<2x128xf32>
    %56 = tpu.matmul %52, %55, %cst_37 {dimension_numbers = #tpu.dot_dimension_numbers<[1], [0], [0], [1], [0, 0, 1, 1], [], []>} : vector<2x128xf32>, vector<128x128xf32>, vector<2x128xf32> -> vector<2x128xf32>
    %57 = arith.addf %54, %56 : vector<2x128xf32>
    %c0_38 = arith.constant 0 : index
    %c0_39 = arith.constant 0 : index
    %58 = vector.load %arg13[%c0_38, %c0_39] : memref<1x128xf32, #tpu.memory_space<vmem>>, vector<1x128xf32>
    %59 = vector.broadcast %58 : vector<1x128xf32> to vector<2x128xf32>
    %60 = arith.addf %57, %59 : vector<2x128xf32>
    %cst_40 = arith.constant 0.000000e+00 : f32
    %61 = vector.broadcast %cst_40 : f32 to vector<2x128xf32>
    %62 = arith.cmpf ogt, %60, %61 : vector<2x128xf32>
    %cst_41 = arith.constant 0.000000e+00 : f32
    %63 = vector.broadcast %cst_41 : f32 to vector<2x128xf32>
    %64 = arith.minimumf %60, %63 : vector<2x128xf32>
    %65 = math.exp %64 : vector<2x128xf32>
    %cst_42 = arith.constant 1.000000e+00 : f32
    %66 = vector.broadcast %cst_42 : f32 to vector<2x128xf32>
    %67 = arith.subf %65, %66 : vector<2x128xf32>
    %68 = arith.select %62, %60, %67 : vector<2x128xi1>, vector<2x128xf32>
    %c0_43 = arith.constant 0 : index
    %c0_44 = arith.constant 0 : index
    %69 = vector.load %arg14[%c0_43, %c0_44] : memref<128x128xf32, #tpu.memory_space<vmem>>, vector<128x128xf32>
    %cst_45 = arith.constant dense<0.000000e+00> : vector<2x128xf32>
    %70 = tpu.matmul %68, %69, %cst_45 {dimension_numbers = #tpu.dot_dimension_numbers<[1], [0], [0], [1], [0, 0, 1, 1], [], []>} : vector<2x128xf32>, vector<128x128xf32>, vector<2x128xf32> -> vector<2x128xf32>
    %c0_46 = arith.constant 0 : index
    %c0_47 = arith.constant 0 : index
    %71 = vector.load %arg15[%c0_46, %c0_47] : memref<1x128xf32, #tpu.memory_space<vmem>>, vector<1x128xf32>
    %72 = vector.broadcast %71 : vector<1x128xf32> to vector<2x128xf32>
    %73 = arith.addf %70, %72 : vector<2x128xf32>
    %cst_48 = arith.constant 0.000000e+00 : f32
    %74 = vector.broadcast %cst_48 : f32 to vector<2x128xf32>
    %75 = arith.cmpf ogt, %73, %74 : vector<2x128xf32>
    %cst_49 = arith.constant 0.000000e+00 : f32
    %76 = vector.broadcast %cst_49 : f32 to vector<2x128xf32>
    %77 = arith.minimumf %73, %76 : vector<2x128xf32>
    %78 = math.exp %77 : vector<2x128xf32>
    %cst_50 = arith.constant 1.000000e+00 : f32
    %79 = vector.broadcast %cst_50 : f32 to vector<2x128xf32>
    %80 = arith.subf %78, %79 : vector<2x128xf32>
    %81 = arith.select %75, %73, %80 : vector<2x128xi1>, vector<2x128xf32>
    %c0_51 = arith.constant 0 : index
    %c0_52 = arith.constant 0 : index
    %82 = vector.load %arg16[%c0_51, %c0_52] : memref<128x128xf32, #tpu.memory_space<vmem>>, vector<128x128xf32>
    %cst_53 = arith.constant dense<0.000000e+00> : vector<2x128xf32>
    %83 = tpu.matmul %81, %82, %cst_53 {dimension_numbers = #tpu.dot_dimension_numbers<[1], [0], [0], [1], [0, 0, 1, 1], [], []>} : vector<2x128xf32>, vector<128x128xf32>, vector<2x128xf32> -> vector<2x128xf32>
    %c0_54 = arith.constant 0 : index
    %c0_55 = arith.constant 0 : index
    %84 = vector.load %arg17[%c0_54, %c0_55] : memref<1x128xf32, #tpu.memory_space<vmem>>, vector<1x128xf32>
    %85 = vector.broadcast %84 : vector<1x128xf32> to vector<2x128xf32>
    %86 = arith.addf %83, %85 : vector<2x128xf32>
    %cst_56 = arith.constant 0.000000e+00 : f32
    %87 = vector.broadcast %cst_56 : f32 to vector<2x128xf32>
    %88 = arith.cmpf ogt, %86, %87 : vector<2x128xf32>
    %cst_57 = arith.constant 0.000000e+00 : f32
    %89 = vector.broadcast %cst_57 : f32 to vector<2x128xf32>
    %90 = arith.minimumf %86, %89 : vector<2x128xf32>
    %91 = math.exp %90 : vector<2x128xf32>
    %cst_58 = arith.constant 1.000000e+00 : f32
    %92 = vector.broadcast %cst_58 : f32 to vector<2x128xf32>
    %93 = arith.subf %91, %92 : vector<2x128xf32>
    %94 = arith.select %88, %86, %93 : vector<2x128xi1>, vector<2x128xf32>
    %c0_59 = arith.constant 0 : index
    %c0_60 = arith.constant 0 : index
    %95 = vector.load %arg18[%c0_59, %c0_60] : memref<128x128xf32, #tpu.memory_space<vmem>>, vector<128x128xf32>
    %cst_61 = arith.constant dense<0.000000e+00> : vector<2x128xf32>
    %96 = tpu.matmul %94, %95, %cst_61 {dimension_numbers = #tpu.dot_dimension_numbers<[1], [0], [0], [1], [0, 0, 1, 1], [], []>} : vector<2x128xf32>, vector<128x128xf32>, vector<2x128xf32> -> vector<2x128xf32>
    %c0_62 = arith.constant 0 : index
    %c0_63 = arith.constant 0 : index
    %97 = vector.load %arg19[%c0_62, %c0_63] : memref<1x128xf32, #tpu.memory_space<vmem>>, vector<1x128xf32>
    %98 = vector.broadcast %97 : vector<1x128xf32> to vector<2x128xf32>
    %99 = arith.addf %96, %98 : vector<2x128xf32>
    %c0_64 = arith.constant 0 : index
    %c0_65 = arith.constant 0 : index
    %100 = vector.load %arg28[%c0_64, %c0_65] : memref<2x128xf32, #tpu.memory_space<vmem>>, vector<2x128xf32>
    tpu.vector_store %arg28[%c0_64, %c0_65], %99 {strides = array<i32>} : memref<2x128xf32, #tpu.memory_space<vmem>>, vector<2x128xf32>,
    %c0_66 = arith.constant 0 : index
    %c0_67 = arith.constant 0 : index
    %101 = vector.load %arg2[%c0_66, %c0_67] : memref<2x32xf32, #tpu.memory_space<vmem>>, vector<2x32xf32>
    %c0_68 = arith.constant 0 : index
    %c0_69 = arith.constant 0 : index
    %102 = vector.load %arg20[%c0_68, %c0_69] : memref<32x128xf32, #tpu.memory_space<vmem>>, vector<32x128xf32>
    %cst_70 = arith.constant dense<0.000000e+00> : vector<2x128xf32>
    %103 = tpu.matmul %101, %102, %cst_70 {dimension_numbers = #tpu.dot_dimension_numbers<[1], [0], [0], [1], [0, 0, 1, 1], [], []>} : vector<2x32xf32>, vector<32x128xf32>, vector<2x128xf32> -> vector<2x128xf32>
    %c0_71 = arith.constant 0 : index
    %c0_72 = arith.constant 0 : index
    %104 = vector.load %arg21[%c0_71, %c0_72] : memref<1x128xf32, #tpu.memory_space<vmem>>, vector<1x128xf32>
    %105 = vector.broadcast %104 : vector<1x128xf32> to vector<2x128xf32>
    %106 = arith.addf %103, %105 : vector<2x128xf32>
    %cst_73 = arith.constant 0.000000e+00 : f32
    %107 = vector.broadcast %cst_73 : f32 to vector<2x128xf32>
    %108 = arith.cmpf ogt, %106, %107 : vector<2x128xf32>
    %cst_74 = arith.constant 0.000000e+00 : f32
    %109 = vector.broadcast %cst_74 : f32 to vector<2x128xf32>
    %110 = arith.minimumf %106, %109 : vector<2x128xf32>
    %111 = math.exp %110 : vector<2x128xf32>
    %cst_75 = arith.constant 1.000000e+00 : f32
    %112 = vector.broadcast %cst_75 : f32 to vector<2x128xf32>
    %113 = arith.subf %111, %112 : vector<2x128xf32>
    %114 = arith.select %108, %106, %113 : vector<2x128xi1>, vector<2x128xf32>
    %c0_76 = arith.constant 0 : index
    %c0_77 = arith.constant 0 : index
    %115 = vector.load %arg22[%c0_76, %c0_77] : memref<128x128xf32, #tpu.memory_space<vmem>>, vector<128x128xf32>
    %cst_78 = arith.constant dense<0.000000e+00> : vector<2x128xf32>
    %116 = tpu.matmul %114, %115, %cst_78 {dimension_numbers = #tpu.dot_dimension_numbers<[1], [0], [0], [1], [0, 0, 1, 1], [], []>} : vector<2x128xf32>, vector<128x128xf32>, vector<2x128xf32> -> vector<2x128xf32>
    %c0_79 = arith.constant 0 : index
    %c0_80 = arith.constant 0 : index
    %117 = vector.load %arg23[%c0_79, %c0_80] : memref<1x128xf32, #tpu.memory_space<vmem>>, vector<1x128xf32>
    %118 = vector.broadcast %117 : vector<1x128xf32> to vector<2x128xf32>
    %119 = arith.addf %116, %118 : vector<2x128xf32>
    %cst_81 = arith.constant 0.000000e+00 : f32
    %120 = vector.broadcast %cst_81 : f32 to vector<2x128xf32>
    %121 = arith.cmpf ogt, %119, %120 : vector<2x128xf32>
    %cst_82 = arith.constant 0.000000e+00 : f32
    %122 = vector.broadcast %cst_82 : f32 to vector<2x128xf32>
    %123 = arith.minimumf %119, %122 : vector<2x128xf32>
    %124 = math.exp %123 : vector<2x128xf32>
    %cst_83 = arith.constant 1.000000e+00 : f32
    %125 = vector.broadcast %cst_83 : f32 to vector<2x128xf32>
    %126 = arith.subf %124, %125 : vector<2x128xf32>
    %127 = arith.select %121, %119, %126 : vector<2x128xi1>, vector<2x128xf32>
    %c0_84 = arith.constant 0 : index
    %c0_85 = arith.constant 0 : index
    %128 = vector.load %arg24[%c0_84, %c0_85] : memref<128x128xf32, #tpu.memory_space<vmem>>, vector<128x128xf32>
    %cst_86 = arith.constant dense<0.000000e+00> : vector<2x128xf32>
    %129 = tpu.matmul %127, %128, %cst_86 {dimension_numbers = #tpu.dot_dimension_numbers<[1], [0], [0], [1], [0, 0, 1, 1], [], []>} : vector<2x128xf32>, vector<128x128xf32>, vector<2x128xf32> -> vector<2x128xf32>
    %c0_87 = arith.constant 0 : index
    %c0_88 = arith.constant 0 : index
    %130 = vector.load %arg25[%c0_87, %c0_88] : memref<1x128xf32, #tpu.memory_space<vmem>>, vector<1x128xf32>
    %131 = vector.broadcast %130 : vector<1x128xf32> to vector<2x128xf32>
    %132 = arith.addf %129, %131 : vector<2x128xf32>
    %cst_89 = arith.constant 0.000000e+00 : f32
    %133 = vector.broadcast %cst_89 : f32 to vector<2x128xf32>
    %134 = arith.cmpf ogt, %132, %133 : vector<2x128xf32>
    %cst_90 = arith.constant 0.000000e+00 : f32
    %135 = vector.broadcast %cst_90 : f32 to vector<2x128xf32>
    %136 = arith.minimumf %132, %135 : vector<2x128xf32>
    %137 = math.exp %136 : vector<2x128xf32>
    %cst_91 = arith.constant 1.000000e+00 : f32
    %138 = vector.broadcast %cst_91 : f32 to vector<2x128xf32>
    %139 = arith.subf %137, %138 : vector<2x128xf32>
    %140 = arith.select %134, %132, %139 : vector<2x128xi1>, vector<2x128xf32>
    %c0_92 = arith.constant 0 : index
    %c0_93 = arith.constant 0 : index
    %141 = vector.load %arg26[%c0_92, %c0_93] : memref<128x128xf32, #tpu.memory_space<vmem>>, vector<128x128xf32>
    %cst_94 = arith.constant dense<0.000000e+00> : vector<2x128xf32>
    %142 = tpu.matmul %140, %141, %cst_94 {dimension_numbers = #tpu.dot_dimension_numbers<[1], [0], [0], [1], [0, 0, 1, 1], [], []>} : vector<2x128xf32>, vector<128x128xf32>, vector<2x128xf32> -> vector<2x128xf32>
    %c0_95 = arith.constant 0 : index
    %c0_96 = arith.constant 0 : index
    %143 = vector.load %arg27[%c0_95, %c0_96] : memref<1x128xf32, #tpu.memory_space<vmem>>, vector<1x128xf32>
    %144 = vector.broadcast %143 : vector<1x128xf32> to vector<2x128xf32>
    %145 = arith.addf %142, %144 : vector<2x128xf32>
    %c0_97 = arith.constant 0 : index
    %c0_98 = arith.constant 0 : index
    %146 = vector.load %arg29[%c0_97, %c0_98] : memref<2x128xf32, #tpu.memory_space<vmem>>, vector<2x128xf32>
    tpu.vector_store %arg29[%c0_97, %c0_98], %145 {strides = array<i32>} : memref<2x128xf32, #tpu.memory_space<vmem>>, vector<2x128xf32>,
    return
  }
  func.func @transform_0(%arg0: i32) -> (i32, i32) {
    %c0_i32 = arith.constant 0 : i32
    %c0_i32_0 = arith.constant 0 : i32
    return %arg0, %c0_i32 : i32, i32
  }
  func.func @transform_1(%arg0: i32) -> (i32, i32) {
    %c0_i32 = arith.constant 0 : i32
    %c0_i32_0 = arith.constant 0 : i32
    return %arg0, %c0_i32 : i32, i32
  }
  func.func @transform_2(%arg0: i32) -> (i32, i32) {
    %c0_i32 = arith.constant 0 : i32
    %c0_i32_0 = arith.constant 0 : i32
    %c0_i32_1 = arith.constant 0 : i32
    return %c0_i32, %c0_i32_0 : i32, i32
  }
  func.func @transform_3(%arg0: i32) -> (i32, i32) {
    %c0_i32 = arith.constant 0 : i32
    %c0_i32_0 = arith.constant 0 : i32
    %c0_i32_1 = arith.constant 0 : i32
    return %c0_i32, %c0_i32_0 : i32, i32
  }
  func.func @transform_4(%arg0: i32) -> (i32, i32) {
    %c0_i32 = arith.constant 0 : i32
    %c0_i32_0 = arith.constant 0 : i32
    %c0_i32_1 = arith.constant 0 : i32
    return %c0_i32, %c0_i32_0 : i32, i32
  }
  func.func @transform_5(%arg0: i32) -> (i32, i32) {
    %c0_i32 = arith.constant 0 : i32
    %c0_i32_0 = arith.constant 0 : i32
    %c0_i32_1 = arith.constant 0 : i32
    return %c0_i32, %c0_i32_0 : i32, i32
  }
  func.func @transform_6(%arg0: i32) -> (i32, i32) {
    %c0_i32 = arith.constant 0 : i32
    %c0_i32_0 = arith.constant 0 : i32
    %c0_i32_1 = arith.constant 0 : i32
    return %c0_i32, %c0_i32_0 : i32, i32
  }
  func.func @transform_7(%arg0: i32) -> (i32, i32) {
    %c0_i32 = arith.constant 0 : i32
    %c0_i32_0 = arith.constant 0 : i32
    %c0_i32_1 = arith.constant 0 : i32
    return %c0_i32, %c0_i32_0 : i32, i32
  }
  func.func @transform_8(%arg0: i32) -> (i32, i32) {
    %c0_i32 = arith.constant 0 : i32
    %c0_i32_0 = arith.constant 0 : i32
    %c0_i32_1 = arith.constant 0 : i32
    return %c0_i32, %c0_i32_0 : i32, i32
  }
  func.func @transform_9(%arg0: i32) -> (i32, i32) {
    %c0_i32 = arith.constant 0 : i32
    %c0_i32_0 = arith.constant 0 : i32
    %c0_i32_1 = arith.constant 0 : i32
    return %c0_i32, %c0_i32_0 : i32, i32
  }
  func.func @transform_10(%arg0: i32) -> (i32, i32) {
    %c0_i32 = arith.constant 0 : i32
    %c0_i32_0 = arith.constant 0 : i32
    %c0_i32_1 = arith.constant 0 : i32
    return %c0_i32, %c0_i32_0 : i32, i32
  }
  func.func @transform_11(%arg0: i32) -> (i32, i32) {
    %c0_i32 = arith.constant 0 : i32
    %c0_i32_0 = arith.constant 0 : i32
    %c0_i32_1 = arith.constant 0 : i32
    return %c0_i32, %c0_i32_0 : i32, i32
  }
  func.func @transform_12(%arg0: i32) -> (i32, i32) {
    %c0_i32 = arith.constant 0 : i32
    %c0_i32_0 = arith.constant 0 : i32
    %c0_i32_1 = arith.constant 0 : i32
    return %c0_i32, %c0_i32_0 : i32, i32
  }
  func.func @transform_13(%arg0: i32) -> (i32, i32) {
    %c0_i32 = arith.constant 0 : i32
    %c0_i32_0 = arith.constant 0 : i32
    %c0_i32_1 = arith.constant 0 : i32
    return %c0_i32, %c0_i32_0 : i32, i32
  }
  func.func @transform_14(%arg0: i32) -> (i32, i32) {
    %c0_i32 = arith.constant 0 : i32
    %c0_i32_0 = arith.constant 0 : i32
    %c0_i32_1 = arith.constant 0 : i32
    return %c0_i32, %c0_i32_0 : i32, i32
  }
  func.func @transform_15(%arg0: i32) -> (i32, i32) {
    %c0_i32 = arith.constant 0 : i32
    %c0_i32_0 = arith.constant 0 : i32
    %c0_i32_1 = arith.constant 0 : i32
    return %c0_i32, %c0_i32_0 : i32, i32
  }
  func.func @transform_16(%arg0: i32) -> (i32, i32) {
    %c0_i32 = arith.constant 0 : i32
    %c0_i32_0 = arith.constant 0 : i32
    %c0_i32_1 = arith.constant 0 : i32
    return %c0_i32, %c0_i32_0 : i32, i32
  }
  func.func @transform_17(%arg0: i32) -> (i32, i32) {
    %c0_i32 = arith.constant 0 : i32
    %c0_i32_0 = arith.constant 0 : i32
    %c0_i32_1 = arith.constant 0 : i32
    return %c0_i32, %c0_i32_0 : i32, i32
  }
  func.func @transform_18(%arg0: i32) -> (i32, i32) {
    %c0_i32 = arith.constant 0 : i32
    %c0_i32_0 = arith.constant 0 : i32
    %c0_i32_1 = arith.constant 0 : i32
    return %c0_i32, %c0_i32_0 : i32, i32
  }
  func.func @transform_19(%arg0: i32) -> (i32, i32) {
    %c0_i32 = arith.constant 0 : i32
    %c0_i32_0 = arith.constant 0 : i32
    %c0_i32_1 = arith.constant 0 : i32
    return %c0_i32, %c0_i32_0 : i32, i32
  }
  func.func @transform_20(%arg0: i32) -> (i32, i32) {
    %c0_i32 = arith.constant 0 : i32
    %c0_i32_0 = arith.constant 0 : i32
    %c0_i32_1 = arith.constant 0 : i32
    return %c0_i32, %c0_i32_0 : i32, i32
  }
  func.func @transform_21(%arg0: i32) -> (i32, i32) {
    %c0_i32 = arith.constant 0 : i32
    %c0_i32_0 = arith.constant 0 : i32
    %c0_i32_1 = arith.constant 0 : i32
    return %c0_i32, %c0_i32_0 : i32, i32
  }
  func.func @transform_22(%arg0: i32) -> (i32, i32) {
    %c0_i32 = arith.constant 0 : i32
    %c0_i32_0 = arith.constant 0 : i32
    %c0_i32_1 = arith.constant 0 : i32
    return %c0_i32, %c0_i32_0 : i32, i32
  }
  func.func @transform_23(%arg0: i32) -> (i32, i32) {
    %c0_i32 = arith.constant 0 : i32
    %c0_i32_0 = arith.constant 0 : i32
    %c0_i32_1 = arith.constant 0 : i32
    return %c0_i32, %c0_i32_0 : i32, i32
  }
  func.func @transform_24(%arg0: i32) -> (i32, i32) {
    %c0_i32 = arith.constant 0 : i32
    %c0_i32_0 = arith.constant 0 : i32
    %c0_i32_1 = arith.constant 0 : i32
    return %c0_i32, %c0_i32_0 : i32, i32
  }
  func.func @transform_25(%arg0: i32) -> (i32, i32) {
    %c0_i32 = arith.constant 0 : i32
    %c0_i32_0 = arith.constant 0 : i32
    %c0_i32_1 = arith.constant 0 : i32
    return %c0_i32, %c0_i32_0 : i32, i32
  }
  func.func @transform_26(%arg0: i32) -> (i32, i32) {
    %c0_i32 = arith.constant 0 : i32
    %c0_i32_0 = arith.constant 0 : i32
    %c0_i32_1 = arith.constant 0 : i32
    return %c0_i32, %c0_i32_0 : i32, i32
  }
  func.func @transform_27(%arg0: i32) -> (i32, i32) {
    %c0_i32 = arith.constant 0 : i32
    %c0_i32_0 = arith.constant 0 : i32
    return %arg0, %c0_i32 : i32, i32
  }
  func.func @transform_28(%arg0: i32) -> (i32, i32) {
    %c0_i32 = arith.constant 0 : i32
    %c0_i32_0 = arith.constant 0 : i32
    return %arg0, %c0_i32 : i32, i32
  }
}

</mosaic_0001>

<bundles_post_ra>
// kernel: forward_hist.1
= control target key start
LH: loop header
LB: loop body
LE: loop exit
PB: predicated region body
PF: predicated region fallthrough
CT: control target
= control target key end

     0   :  { %s3784_s0 = inlined_call_operand.vmem [shape: f32[2,188], index: 0, kind: input, shape index: {}]   ;;  %s3785_s1 = inlined_call_operand.vmem [shape: f32[2,32], index: 1, kind: input, shape index: {}]   ;;  %s3786_s2 = inlined_call_operand.hbm [shape: f32[188,384], index: 2, kind: input, shape index: {}]   ;;  %s3787_s3 = inlined_call_operand.vmem [shape: f32[1,384], index: 3, kind: input, shape index: {}]   ;;  %s3788_s4 = inlined_call_operand.hbm [shape: f32[384,128], index: 4, kind: input, shape index: {}]   ;;  %s3789_s5 = inlined_call_operand.vmem [shape: f32[1,128], index: 5, kind: input, shape index: {}]   ;;  %s3790_s6 = inlined_call_operand.hbm [shape: f32[128,128], index: 6, kind: input, shape index: {}]   ;;  %s3791_s7 = inlined_call_operand.vmem [shape: f32[1,128], index: 7, kind: input, shape index: {}]   ;;  %s3792_s8 = inlined_call_operand.hbm [shape: f32[128,128], index: 8, kind: input, shape index: {}]   ;;  %s3793_s9 = inlined_call_operand.hbm [shape: f32[1,128], index: 9, kind: input, shape index: {}]   ;;  %s3794_s10 = inlined_call_operand.hbm [shape: f32[188,128], index: 10, kind: input, shape index: {}]   ;;  %s3795_s11 = inlined_call_operand.hbm [shape: f32[128,128], index: 11, kind: input, shape index: {}]   ;;  %s3796_s12 = inlined_call_operand.vmem [shape: f32[1,128], index: 12, kind: input, shape index: {}]   ;;  %s3797_s13 = inlined_call_operand.hbm [shape: f32[128,128], index: 13, kind: input, shape index: {}]   ;;  %s3798_s14 = inlined_call_operand.vmem [shape: f32[1,128], index: 14, kind: input, shape index: {}]   ;;  %s3799_s15 = inlined_call_operand.hbm [shape: f32[128,128], index: 15, kind: input, shape index: {}]   ;;  %s3800_s16 = inlined_call_operand.vmem [shape: f32[1,128], index: 16, kind: input, shape index: {}]   ;;  %s3801_s17 = inlined_call_operand.hbm [shape: f32[128,128], index: 17, kind: input, shape index: {}]   ;;  %s3802_s18 = inlined_call_operand.vmem [shape: f32[1,128], index: 18, kind: input, shape index: {}]   ;;  %s3803_s19 = inlined_call_operand.vmem [shape: f32[32,128], index: 19, kind: input, shape index: {}]   ;;  %s3804_s20 = inlined_call_operand.vmem [shape: f32[1,128], index: 20, kind: input, shape index: {}]   ;;  %s3805_s21 = inlined_call_operand.hbm [shape: f32[128,128], index: 21, kind: input, shape index: {}]   ;;  %s3806_s22 = inlined_call_operand.vmem [shape: f32[1,128], index: 22, kind: input, shape index: {}]   ;;  %s3807_s23 = inlined_call_operand.hbm [shape: f32[128,128], index: 23, kind: input, shape index: {}]   ;;  %s3808_s24 = inlined_call_operand.vmem [shape: f32[1,128], index: 24, kind: input, shape index: {}]   ;;  %s3809_s25 = inlined_call_operand.hbm [shape: f32[128,128], index: 25, kind: input, shape index: {}]   ;;  %s3810_s26 = inlined_call_operand.vmem [shape: f32[1,128], index: 26, kind: input, shape index: {}]   ;;  %s3811_s27 = inlined_call_operand.hbm [shape: f32[2,128], index: 27, kind: output, shape index: {0}]   ;;  %s3812_s28 = inlined_call_operand.vmem [shape: f32[2,128], index: 28, kind: output, shape index: {1}]  }
   0x1   :  { %3821 = sst [smem:[#allocation32_spill]] %s3784_s0 }
   0x2   :  { %3822 = sst [smem:[#allocation33_spill]] %s3785_s1 }
   0x3   :  { %3823 = sst [smem:[#allocation34_spill]] %s3786_s2 }
   0x4   :  { %3824 = sst [smem:[#allocation35_spill]] %s3787_s3 }
   0x5   :  { %3825 = sst [smem:[#allocation36_spill]] %s3788_s4 }
   0x6   :  { %3826 = sst [smem:[#allocation37_spill]] %s3789_s5 }
   0x7   :  { %3827 = sst [smem:[#allocation38_spill]] %s3790_s6 }
   0x8   :  { %3828 = sst [smem:[#allocation39_spill]] %s3791_s7 }
   0x9   :  { %3829 = sst [smem:[#allocation40_spill]] %s3792_s8 }
   0xa   :  { %3830 = sst [smem:[#allocation41_spill]] %s3793_s9 }
   0xb   :  { %3831 = sst [smem:[#allocation42_spill]] %s3794_s10 }
   0xc   :  { %3832 = sst [smem:[#allocation43_spill]] %s3795_s11 }
   0xd   :  { %3833 = sst [smem:[#allocation44_spill]] %s3796_s12 }
   0xe   :  { %3834 = sst [smem:[#allocation45_spill]] %s3810_s26 }
   0xf   :  { %3835 = sst [smem:[#allocation46_spill]] %s3811_s27 }
  0x10   :  { %3836 = sst [smem:[#allocation47_spill]] %s3812_s28 }
  0x11   :  { %34 = vsyncpa [#allocation3], 0 }
  0x12   :  { %35 = vsyncpa [#allocation6], 0 }
  0x13   :  { %36 = vsyncpa [#allocation9], 0 }
  0x14   :  { %37 = vsyncpa [#allocation12], 0 }
  0x15   :  { %38 = vsyncpa [#allocation15], 0 }
  0x16   :  { %39 = vsyncpa [#allocation18], 0 }
  0x17   :  { %40 = vsyncpa [#allocation21], 0 }
  0x18   :  { %41 = vsyncpa [#allocation4], 0  ;;  %s3207_s8 = smov [#allocation5]   ;;  %s3837_s3 = sld [smem:[#allocation36_spill]] }
  0x19   :  { %s65_s5 = sshll.u32 %s3207_s8, 4  ;;  %s66_s5 = int_to_ptr.vmem [resolvable:$true] %s65_s5 }
  0x1e   :  { %s2883_s6 = scalar_lea.hbm %s3837_s3, 6144 }
  0x1f   :  { %p2884_p0 = scmp.ne.s32.totalorder %s3837_s3, %s2883_s6  ;;  %p2887_p1 = scmp.lt.u32.totalorder %s2883_s6, %s3837_s3 }
  0x21   :  { %p2889_p2 = pnand %p2887_p1, %p2884_p0 }
  0x23   :  { %2892 = shalt.err (!%p2889_p2)
}
  0x24   :  { %s2893_s2 = scalar_lea.vmem %s66_s5, 6144  ;;  %p2898_p4 = scmp.lt.s32.totalorder %s66_s5, %s66_s5 }
  0x25   :  { %p2894_p3 = scmp.ne.s32.totalorder %s66_s5, %s2893_s2  ;;  %p2899_p5 = scmp.lt.s32.totalorder %s2893_s2, %s2893_s2 }
  0x27   :  { %p2900_p6 = por %p2899_p5, %p2898_p4 }
  0x29   :  { %p2901_p7 = pnand %p2900_p6, %p2894_p3 }
  0x2b   :  { %2904 = shalt.err (!%p2901_p7)
}
  0x2c   :  { %s3208_s7 = smov 128   ;;  %s3209_s12 = smov 8  }
  0x2d   :  { %71 = dma.hbm_to_vmem [thread:$0]  %s3837_s3, 6144, %s66_s5, [#allocation6], %s3208_s7, %s3208_s7, %s3209_s12  }
  0x2e   :  { %s3210_s8 = smov [#allocation8]   ;;  %s3211_s30 = smov [#allocation11]  }
  0x2f   :  { %s93_s9 = sshll.u32 %s3210_s8, 4  ;;  %s115_s6 = sshll.u32 %s3211_s30, 4  ;;  %s94_s9 = int_to_ptr.vmem [resolvable:$true] %s93_s9  ;;  %s116_s6 = int_to_ptr.vmem [resolvable:$true] %s115_s6 }
  0x30   :  { %s3838_s11 = sld [smem:[#allocation40_spill]] }
  0x36   :  { %s2905_s29 = scalar_lea.hbm %s3838_s11, 2048 }
  0x37   :  { %p2906_p8 = scmp.ne.s32.totalorder %s3838_s11, %s2905_s29  ;;  %p2909_p9 = scmp.lt.u32.totalorder %s2905_s29, %s3838_s11 }
  0x39   :  { %p2911_p10 = pnand %p2909_p9, %p2906_p8 }
  0x3b   :  { %2914 = shalt.err (!%p2911_p10)
}
  0x3c   :  { %s2915_s5 = scalar_lea.vmem %s94_s9, 2048  ;;  %p2920_p12 = scmp.lt.s32.totalorder %s94_s9, %s94_s9 }
  0x3d   :  { %p2916_p11 = scmp.ne.s32.totalorder %s94_s9, %s2915_s5  ;;  %p2921_p13 = scmp.lt.s32.totalorder %s2915_s5, %s2915_s5 }
  0x3f   :  { %p2922_p0 = por %p2921_p13, %p2920_p12 }
  0x41   :  { %p2923_p1 = pnand %p2922_p0, %p2916_p11 }
  0x43   :  { %2926 = shalt.err (!%p2923_p1)
}
  0x44   :  { %99 = dma.hbm_to_vmem [thread:$0]  %s3838_s11, 2048, %s94_s9, [#allocation9], %s3208_s7, %s3208_s7, %s3209_s12  }
  0x45   :  { %s3839_s27 = sld [smem:[#allocation42_spill]] }
  0x4b   :  { %s2927_s4 = scalar_lea.hbm %s3839_s27, 3072 }
  0x4c   :  { %p2928_p2 = scmp.ne.s32.totalorder %s3839_s27, %s2927_s4  ;;  %p2931_p3 = scmp.lt.u32.totalorder %s2927_s4, %s3839_s27 }
  0x4e   :  { %p2933_p4 = pnand %p2931_p3, %p2928_p2 }
  0x50   :  { %2936 = shalt.err (!%p2933_p4)
}
  0x51   :  { %s2937_s29 = scalar_lea.vmem %s116_s6, 3072  ;;  %p2942_p6 = scmp.lt.s32.totalorder %s116_s6, %s116_s6 }
  0x52   :  { %p2938_p5 = scmp.ne.s32.totalorder %s116_s6, %s2937_s29  ;;  %p2943_p7 = scmp.lt.s32.totalorder %s2937_s29, %s2937_s29 }
  0x54   :  { %p2944_p8 = por %p2943_p7, %p2942_p6 }
  0x56   :  { %p2945_p9 = pnand %p2944_p8, %p2938_p5 }
  0x58   :  { %2948 = shalt.err (!%p2945_p9)
}
  0x59   :  { %121 = dma.hbm_to_vmem [thread:$0]  %s3839_s27, 3072, %s116_s6, [#allocation12], %s3208_s7, %s3208_s7, %s3209_s12  }
  0x5a   :  { %s3212_s2 = smov [#allocation14]   ;;  %s3213_s3 = smov [#allocation17]  }
  0x5b   :  { %s141_s5 = sshll.u32 %s3212_s2, 4  ;;  %s169_s1 = sshll.u32 %s3213_s3, 4  ;;  %s142_s5 = int_to_ptr.vmem [resolvable:$true] %s141_s5  ;;  %s170_s1 = int_to_ptr.vmem [resolvable:$true] %s169_s1 }
  0x5c   :  { %s2949_s4 = scalar_lea.hbm %s3797_s13, 2048 }
  0x5d   :  { %p2950_p10 = scmp.ne.s32.totalorder %s3797_s13, %s2949_s4  ;;  %p2953_p11 = scmp.lt.u32.totalorder %s2949_s4, %s3797_s13 }
  0x5f   :  { %p2955_p12 = pnand %p2953_p11, %p2950_p10 }
  0x61   :  { %2958 = shalt.err (!%p2955_p12)
}
  0x62   :  { %s2959_s6 = scalar_lea.vmem %s142_s5, 2048  ;;  %p2964_p0 = scmp.lt.s32.totalorder %s142_s5, %s142_s5 }
  0x63   :  { %p2960_p13 = scmp.ne.s32.totalorder %s142_s5, %s2959_s6  ;;  %p2965_p1 = scmp.lt.s32.totalorder %s2959_s6, %s2959_s6 }
  0x65   :  { %p2966_p2 = por %p2965_p1, %p2964_p0 }
  0x67   :  { %p2967_p3 = pnand %p2966_p2, %p2960_p13 }
  0x69   :  { %2970 = shalt.err (!%p2967_p3)
}
  0x6a   :  { %147 = dma.hbm_to_vmem [thread:$0]  %s3797_s13, 2048, %s142_s5, [#allocation15], %s3208_s7, %s3208_s7, %s3209_s12  }
  0x6b   :  { %s2971_s2 = scalar_lea.hbm %s3801_s17, 2048 }
  0x6c   :  { %p2972_p4 = scmp.ne.s32.totalorder %s3801_s17, %s2971_s2  ;;  %p2975_p5 = scmp.lt.u32.totalorder %s2971_s2, %s3801_s17 }
  0x6e   :  { %p2977_p6 = pnand %p2975_p5, %p2972_p4 }
  0x70   :  { %2980 = shalt.err (!%p2977_p6)
}
  0x71   :  { %s2981_s8 = scalar_lea.vmem %s170_s1, 2048  ;;  %p2986_p8 = scmp.lt.s32.totalorder %s170_s1, %s170_s1 }
  0x72   :  { %p2982_p7 = scmp.ne.s32.totalorder %s170_s1, %s2981_s8  ;;  %p2987_p9 = scmp.lt.s32.totalorder %s2981_s8, %s2981_s8 }
  0x74   :  { %p2988_p10 = por %p2987_p9, %p2986_p8 }
  0x76   :  { %p2989_p11 = pnand %p2988_p10, %p2982_p7 }
  0x78   :  { %2992 = shalt.err (!%p2989_p11)
}
  0x79   :  { %175 = dma.hbm_to_vmem [thread:$0]  %s3801_s17, 2048, %s170_s1, [#allocation18], %s3208_s7, %s3208_s7, %s3209_s12  }
  0x7a   :  { %s3214_s30 = smov [#allocation20]   ;;  %s3215_s0 = smov [#allocation2]  }
  0x7b   :  { %s201_s10 = sshll.u32 %s3214_s30, 4  ;;  %s51_s6 = sshll.u32 %s3215_s0, 4  ;;  %s202_s10 = int_to_ptr.vmem [resolvable:$true] %s201_s10  ;;  %s52_s6 = int_to_ptr.vmem [resolvable:$true] %s51_s6 }
  0x7c   :  { %s2993_s9 = scalar_lea.hbm %s3807_s23, 2048 }
  0x7d   :  { %p2994_p12 = scmp.ne.s32.totalorder %s3807_s23, %s2993_s9  ;;  %p2997_p13 = scmp.lt.u32.totalorder %s2993_s9, %s3807_s23 }
  0x7f   :  { %p2999_p0 = pnand %p2997_p13, %p2994_p12 }
  0x81   :  { %3002 = shalt.err (!%p2999_p0)
}
  0x82   :  { %s3003_s17 = scalar_lea.vmem %s202_s10, 2048  ;;  %p3008_p2 = scmp.lt.s32.totalorder %s202_s10, %s202_s10 }
  0x83   :  { %p3004_p1 = scmp.ne.s32.totalorder %s202_s10, %s3003_s17  ;;  %p3009_p3 = scmp.lt.s32.totalorder %s3003_s17, %s3003_s17 }
  0x85   :  { %p3010_p4 = por %p3009_p3, %p3008_p2 }
  0x87   :  { %p3011_p5 = pnand %p3010_p4, %p3004_p1 }
  0x89   :  { %3014 = shalt.err (!%p3011_p5)
}
  0x8a   :  { %207 = dma.hbm_to_vmem [thread:$0]  %s3807_s23, 2048, %s202_s10, [#allocation21], %s3208_s7, %s3208_s7, %s3209_s12  }
  0x8b   :  { %s3840_s13 = sld [smem:[#allocation34_spill]] }
  0x91   :  { %s3015_s5 = scalar_lea.hbm %s3840_s13, 9216 }
  0x92   :  { %p3016_p6 = scmp.ne.s32.totalorder %s3840_s13, %s3015_s5  ;;  %p3019_p7 = scmp.lt.u32.totalorder %s3015_s5, %s3840_s13 }
  0x94   :  { %p3021_p8 = pnand %p3019_p7, %p3016_p6 }
  0x96   :  { %3024 = shalt.err (!%p3021_p8)
}
  0x97   :  { %s3025_s9 = scalar_lea.vmem %s52_s6, 9216  ;;  %p3030_p10 = scmp.lt.s32.totalorder %s52_s6, %s52_s6 }
  0x98   :  { %p3026_p9 = scmp.ne.s32.totalorder %s52_s6, %s3025_s9  ;;  %p3031_p11 = scmp.lt.s32.totalorder %s3025_s9, %s3025_s9 }
  0x9a   :  { %p3032_p12 = por %p3031_p11, %p3030_p10 }
  0x9c   :  { %p3033_p13 = pnand %p3032_p12, %p3026_p9 }
  0x9e   :  { %3036 = shalt.err (!%p3033_p13)
}
  0x9f   :  { %s3216_s23 = smov 384   ;;  %s3217_s10 = smov 24  }
  0xa0   :  { %57 = dma.hbm_to_vmem [thread:$0]  %s3840_s13, 9216, %s52_s6, [#allocation3], %s3216_s23, %s3216_s23, %s3217_s10  }
  0xa1   :  { %s3218_s3 = smov [#allocation7]   ;;  %s3219_s17 = smov [#allocation10]  }
  0xa2   :  { %s79_s28 = sshll.u32 %s3218_s3, 4  ;;  %s106_s1 = sshll.u32 %s3219_s17, 4  ;;  %s80_s28 = int_to_ptr.vmem [resolvable:$true] %s79_s28  ;;  %s107_s1 = int_to_ptr.vmem [resolvable:$true] %s106_s1 }
  0xa3   :  { %s3841_s8 = sld [smem:[#allocation38_spill]] }
  0xa9   :  { %s3037_s5 = scalar_lea.hbm %s3841_s8, 2048 }
  0xaa   :  { %p3038_p0 = scmp.ne.s32.totalorder %s3841_s8, %s3037_s5  ;;  %p3041_p1 = scmp.lt.u32.totalorder %s3037_s5, %s3841_s8 }
  0xac   :  { %p3043_p2 = pnand %p3041_p1, %p3038_p0 }
  0xae   :  { %3046 = shalt.err (!%p3043_p2)
}
  0xaf   :  { %s3047_s6 = scalar_lea.vmem %s80_s28, 2048  ;;  %p3052_p4 = scmp.lt.s32.totalorder %s80_s28, %s80_s28 }
  0xb0   :  { %p3048_p3 = scmp.ne.s32.totalorder %s80_s28, %s3047_s6  ;;  %p3053_p5 = scmp.lt.s32.totalorder %s3047_s6, %s3047_s6 }
  0xb2   :  { %p3054_p6 = por %p3053_p5, %p3052_p4 }
  0xb4   :  { %p3055_p7 = pnand %p3054_p6, %p3048_p3 }
  0xb6   :  { %3058 = shalt.err (!%p3055_p7)
}
  0xb7   :  { %85 = dma.hbm_to_vmem [thread:$0]  %s3841_s8, 2048, %s80_s28, [#allocation6], %s3208_s7, %s3208_s7, %s3209_s12  }
  0xb8   :  { %s3842_s11 = sld [smem:[#allocation41_spill]] }
  0xbe   :  { %s3059_s2 = scalar_lea.hbm %s3842_s11, 16 }
  0xbf   :  { %p3060_p8 = scmp.ne.s32.totalorder %s3842_s11, %s3059_s2  ;;  %p3063_p9 = scmp.lt.u32.totalorder %s3059_s2, %s3842_s11 }
  0xc1   :  { %p3065_p10 = pnand %p3063_p9, %p3060_p8 }
  0xc3   :  { %3068 = shalt.err (!%p3065_p10)
}
  0xc4   :  { %s3069_s5 = scalar_lea.vmem %s107_s1, 16  ;;  %s3073_s30 = scalar_lea.vmem %s107_s1, 32 }
  0xc5   :  { %p3070_p11 = scmp.ne.s32.totalorder %s107_s1, %s3069_s5  ;;  %p3074_p12 = scmp.lt.s32.totalorder %s107_s1, %s107_s1 }
  0xc6   :  { %p3075_p13 = scmp.lt.s32.totalorder %s3073_s30, %s3069_s5 }
  0xc8   :  { %p3076_p0 = por %p3075_p13, %p3074_p12 }
  0xca   :  { %p3077_p1 = pnand %p3076_p0, %p3070_p11 }
  0xcc   :  { %3080 = shalt.err (!%p3077_p1)
}
  0xcd   :  { %109 = dma.hbm_to_vmem [thread:$0]  %s3842_s11, 16, %s107_s1, [#allocation9]  }
  0xce   :  { %s3220_s0 = smov [#allocation13]   ;;  %s3221_s29 = smov [#allocation16]  }
  0xcf   :  { %s127_s27 = sshll.u32 %s3220_s0, 4  ;;  %s155_s6 = sshll.u32 %s3221_s29, 4  ;;  %s128_s27 = int_to_ptr.vmem [resolvable:$true] %s127_s27  ;;  %s156_s6 = int_to_ptr.vmem [resolvable:$true] %s155_s6 }
  0xd0   :  { %s3843_s23 = sld [smem:[#allocation43_spill]] }
  0xd6   :  { %s3081_s10 = scalar_lea.hbm %s3843_s23, 2048 }
  0xd7   :  { %p3082_p2 = scmp.ne.s32.totalorder %s3843_s23, %s3081_s10  ;;  %p3085_p3 = scmp.lt.u32.totalorder %s3081_s10, %s3843_s23 }
  0xd9   :  { %p3087_p4 = pnand %p3085_p3, %p3082_p2 }
  0xdb   :  { %3090 = shalt.err (!%p3087_p4)
}
  0xdc   :  { %s3091_s1 = scalar_lea.vmem %s128_s27, 2048  ;;  %p3096_p6 = scmp.lt.s32.totalorder %s128_s27, %s128_s27 }
  0xdd   :  { %p3092_p5 = scmp.ne.s32.totalorder %s128_s27, %s3091_s1  ;;  %p3097_p7 = scmp.lt.s32.totalorder %s3091_s1, %s3091_s1 }
  0xdf   :  { %p3098_p8 = por %p3097_p7, %p3096_p6 }
  0xe1   :  { %p3099_p9 = pnand %p3098_p8, %p3092_p5 }
  0xe3   :  { %3102 = shalt.err (!%p3099_p9)
}
  0xe4   :  { %133 = dma.hbm_to_vmem [thread:$0]  %s3843_s23, 2048, %s128_s27, [#allocation12], %s3208_s7, %s3208_s7, %s3209_s12  }
  0xe5   :  { %s3103_s28 = scalar_lea.hbm %s3799_s15, 2048 }
  0xe6   :  { %p3104_p10 = scmp.ne.s32.totalorder %s3799_s15, %s3103_s28  ;;  %p3107_p11 = scmp.lt.u32.totalorder %s3103_s28, %s3799_s15 }
  0xe8   :  { %p3109_p12 = pnand %p3107_p11, %p3104_p10 }
  0xea   :  { %3112 = shalt.err (!%p3109_p12)
}
  0xeb   :  { %s3113_s9 = scalar_lea.vmem %s156_s6, 2048  ;;  %p3118_p0 = scmp.lt.s32.totalorder %s156_s6, %s156_s6 }
  0xec   :  { %p3114_p13 = scmp.ne.s32.totalorder %s156_s6, %s3113_s9  ;;  %p3119_p1 = scmp.lt.s32.totalorder %s3113_s9, %s3113_s9 }
  0xee   :  { %p3120_p2 = por %p3119_p1, %p3118_p0 }
  0xf0   :  { %p3121_p3 = pnand %p3120_p2, %p3114_p13 }
  0xf2   :  { %3124 = shalt.err (!%p3121_p3)
}
  0xf3   :  { %161 = dma.hbm_to_vmem [thread:$0]  %s3799_s15, 2048, %s156_s6, [#allocation15], %s3208_s7, %s3208_s7, %s3209_s12  }
  0xf4   :  { %s3222_s10 = smov [#allocation19]   ;;  %s3223_s3 = smov [#allocation22]  }
  0xf5   :  { %s187_s2 = sshll.u32 %s3222_s10, 4  ;;  %s215_s17 = sshll.u32 %s3223_s3, 4  ;;  %s188_s2 = int_to_ptr.vmem [resolvable:$true] %s187_s2  ;;  %s216_s17 = int_to_ptr.vmem [resolvable:$true] %s215_s17 }
  0xf6   :  { %s3125_s11 = scalar_lea.hbm %s3805_s21, 2048 }
  0xf7   :  { %p3126_p4 = scmp.ne.s32.totalorder %s3805_s21, %s3125_s11  ;;  %p3129_p5 = scmp.lt.u32.totalorder %s3125_s11, %s3805_s21 }
  0xf9   :  { %p3131_p6 = pnand %p3129_p5, %p3126_p4 }
  0xfb   :  { %3134 = shalt.err (!%p3131_p6)
}
  0xfc   :  { %s3135_s15 = scalar_lea.vmem %s188_s2, 2048  ;;  %p3140_p8 = scmp.lt.s32.totalorder %s188_s2, %s188_s2 }
  0xfd   :  { %p3136_p7 = scmp.ne.s32.totalorder %s188_s2, %s3135_s15  ;;  %p3141_p9 = scmp.lt.s32.totalorder %s3135_s15, %s3135_s15 }
  0xff   :  { %p3142_p10 = por %p3141_p9, %p3140_p8 }
 0x101   :  { %p3143_p11 = pnand %p3142_p10, %p3136_p7 }
 0x103   :  { %3146 = shalt.err (!%p3143_p11)
}
 0x104   :  { %193 = dma.hbm_to_vmem [thread:$0]  %s3805_s21, 2048, %s188_s2, [#allocation18], %s3208_s7, %s3208_s7, %s3209_s12  }
 0x105   :  { %s3147_s13 = scalar_lea.hbm %s3809_s25, 2048 }
 0x106   :  { %p3148_p12 = scmp.ne.s32.totalorder %s3809_s25, %s3147_s13  ;;  %p3151_p13 = scmp.lt.u32.totalorder %s3147_s13, %s3809_s25 }
 0x108   :  { %p3153_p0 = pnand %p3151_p13, %p3148_p12 }
 0x10a   :  { %3156 = shalt.err (!%p3153_p0)
}
 0x10b   :  { %s3157_s3 = scalar_lea.vmem %s216_s17, 2048  ;;  %p3162_p2 = scmp.lt.s32.totalorder %s216_s17, %s216_s17 }
 0x10c   :  { %p3158_p1 = scmp.ne.s32.totalorder %s216_s17, %s3157_s3  ;;  %p3163_p3 = scmp.lt.s32.totalorder %s3157_s3, %s3157_s3 }
 0x10e   :  { %p3164_p4 = por %p3163_p3, %p3162_p2 }
 0x110   :  { %p3165_p5 = pnand %p3164_p4, %p3158_p1 }
 0x112   :  { %3168 = shalt.err (!%p3165_p5)
}
 0x113   :  { %221 = dma.hbm_to_vmem [thread:$0]  %s3809_s25, 2048, %s216_s17, [#allocation21], %s3208_s7, %s3208_s7, %s3209_s12  }
 0x114   :  { %3191 = dma.done.wait [#allocation3], 9216  }
 0x115   :  { %3192 = vsyncadd [#allocation3], 4294958080 }
 0x116   :  { %3193 = dma.done.wait [#allocation6], 8192  }
 0x117   :  { %3194 = vsyncadd [#allocation6], 4294959104 }
 0x118   :  { %3195 = dma.done.wait [#allocation9], 2064  }
 0x119   :  { %3196 = vsyncadd [#allocation9], 4294965232 }
 0x11a   :  { %3197 = dma.done.wait [#allocation12], 5120  }
 0x11b   :  { %3198 = vsyncadd [#allocation12], 4294962176 }
 0x11c   :  { %3199 = dma.done.wait [#allocation15], 4096  }
 0x11d   :  { %3200 = vsyncadd [#allocation15], 4294963200 }
 0x11e   :  { %3201 = dma.done.wait [#allocation18], 4096  }
 0x11f   :  { %3202 = vsyncadd [#allocation18], 4294963200 }
 0x120   :  { %3203 = dma.done.wait [#allocation21], 4096  }
 0x121   :  { %3204 = vsyncadd [#allocation21], 4294963200  ;;  %v3224_v0 = vmov 0.0|0.0   ;;  %v265_v1 = vld [vmem:[#allocation2 + $0x8] sm:$0xff]  ;;  %v268_v2 = vld [vmem:[#allocation2 + $0x20] sm:$0xff]  ;;  %s3844_s12 = sld [smem:[#allocation32_spill]] }
 0x122   :  { %2485 = vmatprep.subr.bf16.mxu1 %v3224_v0  ;;  %v266_v3 = vld [vmem:[#allocation2 + $0x10] sm:$0xff]  ;;  %v2435_v4 = vpack.c.bf16 %v268_v2, %v265_v1  ;;  %v269_v5 = vld [vmem:[#allocation2 + $0x28] sm:$0xff]  ;;  %v264_v6 = vld [vmem:[#allocation2] sm:$0xff]  ;;  %vm363_vm0 = vcmask 490496   ;;  %vm366_vm1 = vcmask 1043456   ;;  %vm3225_vm2 = vmmov 1  }
 0x123   :  { %v267_v7 = vld [vmem:[#allocation2 + $0x18] sm:$0xff]  ;;  %v2486_v8 = vpack.c.bf16 %v269_v5, %v266_v3  ;;  %v274_v11 = vld [vmem:[#allocation2 + $0x50] sm:$0xff]  ;;  %v272_v12 = vld [vmem:[#allocation2 + $0x40] sm:$0xff]  ;;  %vm3226_vm4 = vmmov 0   ;;  %s3847_s1 = sld [smem:[#allocation35_spill]]  ;;  %s3848_s5 = sld [smem:[#allocation37_spill]] }
 0x124   :  { %v2437_v9 = vpack.c.bf16 %v267_v7, %v264_v6  ;;  %v271_v10 = vld [vmem:[#allocation2 + $0x38] sm:$0xff]  ;;  %2436 = vmatprep.subr.bf16.mxu0 %v2435_v4  ;;  %v270_v15 = vld [vmem:[#allocation2 + $0x30] sm:$0xff]  ;;  %v273_v16 = vld [vmem:[#allocation2 + $0x48] sm:$0xff]  ;;  %s3849_s15 = sld [smem:[#allocation39_spill]]  ;;  %s3850_s0 = sld [smem:[#allocation44_spill]]  ;;  %vm1435_vm14 = vcmask 261120  }
 0x125   :  { %v2439_v13 = vpack.c.bf16 %v274_v11, %v271_v10  ;;  %v275_v14 = vld [vmem:[#allocation2 + $0x58] sm:$0xff]  ;;  %2487 = vmatpush1.bf16.msra.mxu1 %v2486_v8  ;;  %v2441_v18 = vpack.c.bf16 %v273_v16, %v270_v15  ;;  %v277_v19 = vld [vmem:[#allocation2 + $0x68] sm:$0xff]  ;;  %v280_v20 = vld [vmem:[#allocation2 + $0x80] sm:$0xff]  ;;  %s3851_s17 = sld [smem:[#allocation33_spill]] }
 0x126   :  { %2438 = vmatpush1.bf16.msra.mxu0 %v2437_v9  ;;  %v2489_v17 = vpack.c.bf16 %v275_v14, %v272_v12  ;;  %v278_v21 = vld [vmem:[#allocation2 + $0x70] sm:$0xff]  ;;  %2488 = vmatprep.subr.bf16.mxu1 %v3224_v0  ;;  %v2443_v22 = vpack.c.bf16 %v280_v20, %v277_v19  ;;  %v281_v23 = vld [vmem:[#allocation2 + $0x88] sm:$0xff]  ;;  %v276_v24 = vld [vmem:[#allocation2 + $0x60] sm:$0xff] }
 0x127   :  { %2440 = vmatprep.subr.bf16.mxu0 %v2439_v13  ;;  %v279_v25 = vld [vmem:[#allocation2 + $0x78] sm:$0xff]  ;;  %v286_v27 = vld [vmem:[#allocation2 + $0xb0] sm:$0xff]  ;;  %v2492_v28 = vpack.c.bf16 %v281_v23, %v278_v21  ;;  %v284_v30 = vld [vmem:[#allocation2 + $0xa0] sm:$0xff] }
 0x128   :  { %v283_v26 = vld [vmem:[#allocation2 + $0x98] sm:$0xff]  ;;  %v2445_v29 = vpack.c.bf16 %v279_v25, %v276_v24  ;;  %v282_v33 = vld [vmem:[#allocation2 + $0x90] sm:$0xff]  ;;  %v285_v34 = vld [vmem:[#allocation2 + $0xa8] sm:$0xff] }
 0x129   :  { %2490 = vmatpush1.bf16.msra.mxu1 %v2489_v17  ;;  %v2447_v31 = vpack.c.bf16 %v286_v27, %v283_v26  ;;  %v287_v32 = vld [vmem:[#allocation2 + $0xb8] sm:$0xff]  ;;  %v289_v35 = vld [vmem:[#allocation2 + $0xc8] sm:$0xff]  ;;  %v292_v36 = vld [vmem:[#allocation2 + $0xe0] sm:$0xff]  ;;  %v2449_v38 = vpack.c.bf16 %v285_v34, %v282_v33 }
 0x12a   :  { %2442 = vmatpush1.bf16.msra.mxu0 %v2441_v18  ;;  %2491 = vmatprep.subr.bf16.mxu1 %v3224_v0  ;;  %v2495_v37 = vpack.c.bf16 %v287_v32, %v284_v30  ;;  %v290_v39 = vld [vmem:[#allocation2 + $0xd0] sm:$0xff]  ;;  %v2451_v40 = vpack.c.bf16 %v292_v36, %v289_v35  ;;  %v293_v41 = vld [vmem:[#allocation2 + $0xe8] sm:$0xff]  ;;  %v288_v42 = vld [vmem:[#allocation2 + $0xc0] sm:$0xff] }
 0x12b   :  { %2444 = vmatprep.subr.bf16.mxu0 %v2443_v22  ;;  %v291_v43 = vld [vmem:[#allocation2 + $0xd8] sm:$0xff]  ;;  %v298_v45 = vld [vmem:[#allocation2 + $0x110] sm:$0xff]  ;;  %v2498_v46 = vpack.c.bf16 %v293_v41, %v290_v39  ;;  %v296_v48 = vld [vmem:[#allocation2 + $0x100] sm:$0xff] }
 0x12c   :  { %v295_v44 = vld [vmem:[#allocation2 + $0xf8] sm:$0xff]  ;;  %v2453_v47 = vpack.c.bf16 %v291_v43, %v288_v42  ;;  %v294_v51 = vld [vmem:[#allocation2 + $0xf0] sm:$0xff]  ;;  %v297_v52 = vld [vmem:[#allocation2 + $0x108] sm:$0xff] }
 0x12d   :  { %2493 = vmatpush1.bf16.msra.mxu1 %v2492_v28  ;;  %v2455_v49 = vpack.c.bf16 %v298_v45, %v295_v44  ;;  %v299_v50 = vld [vmem:[#allocation2 + $0x118] sm:$0xff]  ;;  %v301_v53 = vld [vmem:[#allocation2 + $0x128] sm:$0xff]  ;;  %v304_v54 = vld [vmem:[#allocation2 + $0x140] sm:$0xff]  ;;  %v2457_v56 = vpack.c.bf16 %v297_v52, %v294_v51 }
 0x12e   :  { %2446 = vmatpush1.bf16.msra.mxu0 %v2445_v29  ;;  %2494 = vmatprep.subr.bf16.mxu1 %v3224_v0  ;;  %v2501_v55 = vpack.c.bf16 %v299_v50, %v296_v48  ;;  %v302_v57 = vld [vmem:[#allocation2 + $0x130] sm:$0xff]  ;;  %v2459_v58 = vpack.c.bf16 %v304_v54, %v301_v53  ;;  %v305_v59 = vld [vmem:[#allocation2 + $0x148] sm:$0xff]  ;;  %v300_v60 = vld [vmem:[#allocation2 + $0x120] sm:$0xff] }
 0x12f   :  { %2448 = vmatprep.subr.bf16.mxu0 %v2447_v31  ;;  %v303_v61 = vld [vmem:[#allocation2 + $0x138] sm:$0xff]  ;;  %v310_v63 = vld [vmem:[#allocation2 + $0x170] sm:$0xff]  ;;  %v2504_v1 = vpack.c.bf16 %v305_v59, %v302_v57  ;;  %v308_v3 = vld [vmem:[#allocation2 + $0x160] sm:$0xff] }
 0x130   :  { %v307_v62 = vld [vmem:[#allocation2 + $0x158] sm:$0xff]  ;;  %v2461_v2 = vpack.c.bf16 %v303_v61, %v300_v60  ;;  %v3572_v4 = vld.sshfl [vmem:[%s3844_s12] sm:$0x33 pattern:$0x76325410]  ;;  %v306_v7 = vld [vmem:[#allocation2 + $0x150] sm:$0xff] }
 0x131   :  { %2496 = vmatpush1.bf16.msra.mxu1 %v2495_v37  ;;  %v2463_v5 = vpack.c.bf16 %v310_v63, %v307_v62  ;;  %v311_v6 = vld [vmem:[#allocation2 + $0x178] sm:$0xff]  ;;  %v309_v8 = vld [vmem:[#allocation2 + $0x168] sm:$0xff]  ;;  %v3577_v9 = vcombine.high %v3572_v4, %v3572_v4  ;;  %v316_v11 = vld [vmem:[#allocation2 + $0x1a0] sm:$0xff] }
 0x132   :  { %2450 = vmatpush1.bf16.msra.mxu0 %v2449_v38  ;;  %2497 = vmatprep.subr.bf16.mxu1 %v3224_v0  ;;  %v313_v10 = vld [vmem:[#allocation2 + $0x188] sm:$0xff]  ;;  %v2507_v12 = vpack.c.bf16 %v311_v6, %v308_v3  ;;  %v2465_v13 = vpack.c.bf16 %v309_v8, %v306_v7  ;;  %v314_v14 = vld [vmem:[#allocation2 + $0x190] sm:$0xff]  ;;  %v312_v17 = vld [vmem:[#allocation2 + $0x180] sm:$0xff] }
 0x133   :  { %2452 = vmatprep.subr.bf16.mxu0 %v2451_v40  ;;  %1837 = vmatprep.mubr.msk.f32.mxu1 %vm363_vm0, %v3577_v9  ;;  %v2467_v15 = vpack.c.bf16 %v316_v11, %v313_v10  ;;  %v317_v16 = vld [vmem:[#allocation2 + $0x1a8] sm:$0xff]  ;;  %v315_v18 = vld [vmem:[#allocation2 + $0x198] sm:$0xff]  ;;  %v322_v20 = vld [vmem:[#allocation2 + $0x1d0] sm:$0xff] }
 0x134   :  { %1835 = vmatprep.mubr.msk.f32.mxu0 %vm363_vm0, %v3577_v9  ;;  %v319_v19 = vld [vmem:[#allocation2 + $0x1b8] sm:$0xff]  ;;  %v2510_v21 = vpack.c.bf16 %v317_v16, %v314_v14  ;;  %v2469_v22 = vpack.c.bf16 %v315_v18, %v312_v17  ;;  %v320_v23 = vld [vmem:[#allocation2 + $0x1c0] sm:$0xff]  ;;  %v318_v26 = vld [vmem:[#allocation2 + $0x1b0] sm:$0xff] }
 0x135   :  { %2499 = vmatpush1.bf16.msra.mxu1 %v2498_v46  ;;  %v2471_v24 = vpack.c.bf16 %v322_v20, %v319_v19  ;;  %v323_v25 = vld [vmem:[#allocation2 + $0x1d8] sm:$0xff]  ;;  %v321_v27 = vld [vmem:[#allocation2 + $0x1c8] sm:$0xff]  ;;  %v328_v29 = vld [vmem:[#allocation2 + $0x200] sm:$0xff] }
 0x136   :  { %2454 = vmatpush1.bf16.msra.mxu0 %v2453_v47  ;;  %2500 = vmatprep.subr.bf16.mxu1 %v3224_v0  ;;  %v325_v28 = vld [vmem:[#allocation2 + $0x1e8] sm:$0xff]  ;;  %v2513_v30 = vpack.c.bf16 %v323_v25, %v320_v23  ;;  %v2473_v31 = vpack.c.bf16 %v321_v27, %v318_v26  ;;  %v326_v32 = vld [vmem:[#allocation2 + $0x1f0] sm:$0xff]  ;;  %v324_v35 = vld [vmem:[#allocation2 + $0x1e0] sm:$0xff] }
 0x137   :  { %2456 = vmatprep.subr.bf16.mxu0 %v2455_v49  ;;  %v2475_v33 = vpack.c.bf16 %v328_v29, %v325_v28  ;;  %v329_v34 = vld [vmem:[#allocation2 + $0x208] sm:$0xff]  ;;  %v327_v36 = vld [vmem:[#allocation2 + $0x1f8] sm:$0xff]  ;;  %v334_v38 = vld [vmem:[#allocation2 + $0x230] sm:$0xf] }
 0x138   :  { %v331_v37 = vld [vmem:[#allocation2 + $0x218] sm:$0xff]  ;;  %v2516_v39 = vpack.c.bf16 %v329_v34, %v326_v32  ;;  %v2477_v40 = vpack.c.bf16 %v327_v36, %v324_v35  ;;  %v332_v41 = vld [vmem:[#allocation2 + $0x220] sm:$0xff]  ;;  %v330_v44 = vld [vmem:[#allocation2 + $0x210] sm:$0xff] }
 0x139   :  { %2502 = vmatpush1.bf16.msra.mxu1 %v2501_v55  ;;  %v2479_v42 = vpack.c.bf16 %v334_v38, %v331_v37  ;;  %v335_v43 = vld [vmem:[#allocation2 + $0x238] sm:$0xf]  ;;  %v333_v45 = vld [vmem:[#allocation2 + $0x228] sm:$0xf]  ;;  %vm3587_vm3 = vmpackc.low %vm366_vm1, %vm3225_vm2 }
 0x13a   :  { %2458 = vmatpush1.bf16.msra.mxu0 %v2457_v56  ;;  %2503 = vmatprep.subr.bf16.mxu1 %v3224_v0  ;;  %v551_v47 = vld [vmem:[#allocation5 + $0x80] sm:$0xff]  ;;  %v552_v48 = vld [vmem:[#allocation5 + $0x88] sm:$0xff]  ;;  %v2519_v49 = vpack.c.bf16 %v335_v43, %v332_v41  ;;  %v2482_v50 = vpack.c.bf16 %v333_v45, %v330_v44  ;;  %v553_v56 = vld [vmem:[#allocation5 + $0x90] sm:$0xff]  ;;  %v3227_v43 = vmov 0.0  }
 0x13b   :  { %2460 = vmatprep.subr.bf16.mxu0 %v2459_v58  ;;  %v567_v51 = vld [vmem:[#allocation5 + $0x100] sm:$0xff]  ;;  %v568_v52 = vld [vmem:[#allocation5 + $0x108] sm:$0xff]  ;;  %v2522_v53 = vpack.c.bf16 %v552_v48, %v551_v47  ;;  %v554_v57 = vld [vmem:[#allocation5 + $0x98] sm:$0xff] }
 0x13c   :  { %v535_v54 = vld [vmem:[#allocation5] sm:$0xff]  ;;  %v536_v55 = vld [vmem:[#allocation5 + $0x8] sm:$0xff]  ;;  %v2555_v58 = vpack.c.bf16 %v568_v52, %v567_v51  ;;  %v569_v60 = vld [vmem:[#allocation5 + $0x110] sm:$0xff]  ;;  %v2526_v62 = vpack.c.bf16 %v554_v57, %v553_v56 }
 0x13d   :  { %2505 = vmatpush1.bf16.msra.mxu1 %v2504_v1  ;;  %v2524_v59 = vpack.c.bf16 %v536_v55, %v535_v54  ;;  %v570_v61 = vld [vmem:[#allocation5 + $0x118] sm:$0xff]  ;;  %v537_v63 = vld [vmem:[#allocation5 + $0x10] sm:$0xff]  ;;  %v572_v6 = vld [vmem:[#allocation5 + $0x128] sm:$0xff] }
 0x13e   :  { %2462 = vmatpush1.bf16.msra.mxu0 %v2461_v2  ;;  %2506 = vmatprep.subr.bf16.mxu1 %v3224_v0  ;;  %v538_v1 = vld [vmem:[#allocation5 + $0x18] sm:$0xff]  ;;  %v2558_v2 = vpack.c.bf16 %v570_v61, %v569_v60  ;;  %v555_v8 = vld [vmem:[#allocation5 + $0xa0] sm:$0xff]  ;;  %v556_v10 = vld [vmem:[#allocation5 + $0xa8] sm:$0xff] }
 0x13f   :  { %2464 = vmatprep.subr.bf16.mxu0 %v2463_v5  ;;  %v2528_v3 = vpack.c.bf16 %v538_v1, %v537_v63  ;;  %v571_v5 = vld [vmem:[#allocation5 + $0x120] sm:$0xff]  ;;  %v2530_v11 = vpack.c.bf16 %v556_v10, %v555_v8  ;;  %v574_v16 = vld [vmem:[#allocation5 + $0x138] sm:$0xff]  ;;  %v557_v18 = vld [vmem:[#allocation5 + $0xb0] sm:$0xff] }
 0x140   :  { %v2561_v7 = vpack.c.bf16 %v572_v6, %v571_v5  ;;  %v558_v19 = vld [vmem:[#allocation5 + $0xb8] sm:$0xff]  ;;  %v576_v25 = vld [vmem:[#allocation5 + $0x148] sm:$0xff]  ;;  %v559_v27 = vld [vmem:[#allocation5 + $0xc0] sm:$0xff] }
 0x141   :  { %2508 = vmatpush1.bf16.msra.mxu1 %v2507_v12  ;;  %v539_v12 = vld [vmem:[#allocation5 + $0x20] sm:$0xff]  ;;  %v2534_v20 = vpack.c.bf16 %v558_v19, %v557_v18  ;;  %v560_v28 = vld [vmem:[#allocation5 + $0xc8] sm:$0xff]  ;;  %v578_v34 = vld [vmem:[#allocation5 + $0x158] sm:$0xff] }
 0x142   :  { %2466 = vmatpush1.bf16.msra.mxu0 %v2465_v13  ;;  %2509 = vmatprep.subr.bf16.mxu1 %v3224_v0  ;;  %v540_v13 = vld [vmem:[#allocation5 + $0x28] sm:$0xff]  ;;  %v2538_v29 = vpack.c.bf16 %v560_v28, %v559_v27  ;;  %v561_v36 = vld [vmem:[#allocation5 + $0xd0] sm:$0xff]  ;;  %v562_v37 = vld [vmem:[#allocation5 + $0xd8] sm:$0xff] }
 0x143   :  { %2468 = vmatprep.subr.bf16.mxu0 %v2467_v15  ;;  %v2532_v14 = vpack.c.bf16 %v540_v13, %v539_v12  ;;  %v573_v15 = vld [vmem:[#allocation5 + $0x130] sm:$0xff]  ;;  %v579_v41 = vld [vmem:[#allocation5 + $0x160] sm:$0xff]  ;;  %v564_v48 = vld [vmem:[#allocation5 + $0xe8] sm:$0xff] }
 0x144   :  { %v2564_v17 = vpack.c.bf16 %v574_v16, %v573_v15  ;;  %v545_v38 = vld [vmem:[#allocation5 + $0x50] sm:$0xff]  ;;  %v563_v47 = vld [vmem:[#allocation5 + $0xe0] sm:$0xff]  ;;  %v548_v51 = vld [vmem:[#allocation5 + $0x68] sm:$0xff] }
 0x145   :  { %2511 = vmatpush1.bf16.msra.mxu1 %v2510_v21  ;;  %v541_v21 = vld [vmem:[#allocation5 + $0x30] sm:$0xff]  ;;  %v566_v56 = vld [vmem:[#allocation5 + $0xf8] sm:$0xff]  ;;  %v737_v27 = vld [vmem:[#allocation7 + $0x8] sm:$0xff] }
 0x146   :  { %2470 = vmatpush1.bf16.msra.mxu0 %v2469_v22  ;;  %2512 = vmatprep.subr.bf16.mxu1 %v3224_v0  ;;  %v542_v22 = vld [vmem:[#allocation5 + $0x38] sm:$0xff]  ;;  %v581_v52 = vld [vmem:[#allocation5 + $0x170] sm:$0xff] }
 0x147   :  { %2472 = vmatprep.subr.bf16.mxu0 %v2471_v24  ;;  %v2536_v23 = vpack.c.bf16 %v542_v22, %v541_v21  ;;  %v575_v24 = vld [vmem:[#allocation5 + $0x140] sm:$0xff]  ;;  %v565_v55 = vld [vmem:[#allocation5 + $0xf0] sm:$0xff]  ;;  %v550_v60 = vld [vmem:[#allocation5 + $0x78] sm:$0xff] }
 0x148   :  { %v2567_v26 = vpack.c.bf16 %v576_v25, %v575_v24  ;;  %v1132_v46 = vld [vmem:[#allocation14 + $0x8] sm:$0xff] }
 0x149   :  { %2514 = vmatpush1.bf16.msra.mxu1 %v2513_v30  ;;  %v543_v30 = vld [vmem:[#allocation5 + $0x40] sm:$0xff] }
 0x14a   :  { %2474 = vmatpush1.bf16.msra.mxu0 %v2473_v31  ;;  %2515 = vmatprep.subr.bf16.mxu1 %v3224_v0  ;;  %v544_v31 = vld [vmem:[#allocation5 + $0x48] sm:$0xff] }
 0x14b   :  { %2476 = vmatprep.subr.bf16.mxu0 %v2475_v33  ;;  %v2540_v32 = vpack.c.bf16 %v544_v31, %v543_v30  ;;  %v577_v33 = vld [vmem:[#allocation5 + $0x150] sm:$0xff] }
 0x14c   :  { %v2570_v35 = vpack.c.bf16 %v578_v34, %v577_v33 }
 0x14d   :  { %2517 = vmatpush1.bf16.msra.mxu1 %v2516_v39  ;;  %v2542_v39 = vpack.c.bf16 %v562_v37, %v561_v36  ;;  %v739_v36 = vld [vmem:[#allocation7 + $0x18] sm:$0xff] }
 0x14e   :  { %2478 = vmatpush1.bf16.msra.mxu0 %v2477_v40  ;;  %2518 = vmatprep.subr.bf16.mxu1 %v3224_v0  ;;  %v546_v40 = vld [vmem:[#allocation5 + $0x58] sm:$0xff] }
 0x14f   :  { %2481 = vmatprep.subr.msk.bf16.mxu0 %vm3587_vm3, %v2479_v42  ;;  %v580_v42 = vld [vmem:[#allocation5 + $0x168] sm:$0xff]  ;;  %v2544_v44 = vpack.c.bf16 %v546_v40, %v545_v38  ;;  %v740_v38 = vld [vmem:[#allocation7 + $0x20] sm:$0xff] }
 0x150   :  { %v2573_v45 = vpack.c.bf16 %v580_v42, %v579_v41  ;;  %v742_v41 = vld [vmem:[#allocation7 + $0x30] sm:$0xff]  ;;  %v743_v42 = vld [vmem:[#allocation7 + $0x38] sm:$0xff] }
 0x151   :  { %2521 = vmatpush1.bf16.msk.msra.mxu1 %vm3587_vm3, %v2519_v49  ;;  %v547_v49 = vld [vmem:[#allocation5 + $0x60] sm:$0xff] }
 0x152   :  { %2484 = vmatpush1.bf16.msk.msra.mxu0 %vm3587_vm3, %v2482_v50  ;;  %2554 = vmatprep.subr.bf16.mxu1 %v3224_v0  ;;  %v2546_v50 = vpack.c.bf16 %v564_v48, %v563_v47  ;;  %v2548_v54 = vpack.c.bf16 %v548_v51, %v547_v49  ;;  %v745_v47 = vld [vmem:[#allocation7 + $0x48] sm:$0xff]  ;;  %v746_v49 = vld [vmem:[#allocation7 + $0x50] sm:$0xff]  ;;  %v748_v51 = vld [vmem:[#allocation7 + $0x60] sm:$0xff] }
 0x153   :  { %2523 = vmatprep.subr.bf16.mxu0 %v2522_v53  ;;  %v582_v53 = vld [vmem:[#allocation5 + $0x178] sm:$0xff] }
 0x154   :  { %512 = vmatmul.mubr.f32.vlgmr.msra.gmra.mrb[0].mxu1 %v3572_v4  ;;  %v2576_v57 = vpack.c.bf16 %v582_v53, %v581_v52  ;;  %v749_v53 = vld [vmem:[#allocation7 + $0x68] sm:$0xff] }
 0x155   :  { %441 = vmatmul.mubr.f32.vlgmr.msra.gmra.mrb[0].mxu0 %v3572_v4  ;;  %2556 = vmatpush3.bf16.msra.mxu1 %v2555_v58  ;;  %v2550_v58 = vpack.c.bf16 %v566_v56, %v565_v55  ;;  %v750_v55 = vld [vmem:[#allocation7 + $0x70] sm:$0xff]  ;;  %v751_v56 = vld [vmem:[#allocation7 + $0x78] sm:$0xff] }
 0x156   :  { %2525 = vmatpush3.bf16.msra.mxu0 %v2524_v59  ;;  %2557 = vmatprep.subr.bf16.mxu1 %v3224_v0  ;;  %v549_v59 = vld [vmem:[#allocation5 + $0x70] sm:$0xff] }
 0x157   :  { %2527 = vmatprep.subr.bf16.mxu0 %v2526_v62  ;;  %2106 = vmatprep.mubr.msk.f32.mxu1 %vm3226_vm4, %v3227_v43  ;;  %v2552_v61 = vpack.c.bf16 %v550_v60, %v549_v59  ;;  %v338_v62 = vlaneseq  ;;  %v836_v59 = vld [vmem:[#allocation8 + $0x8] sm:$0xff]  ;;  %v837_v60 = vld [vmem:[#allocation8 + $0x10] sm:$0xff] }
 0x159   :  { %2559 = vmatpush3.bf16.msra.mxu1 %v2558_v2  ;;  %v339_v63 = vshrl.u32 %v338_v62, 7  ;;  %v838_v62 = vld [vmem:[#allocation8 + $0x18] sm:$0xff] }
 0x15a   :  { %2529 = vmatpush3.bf16.msra.mxu0 %v2528_v3  ;;  %2560 = vmatprep.subr.bf16.mxu1 %v3224_v0  ;;  %v336_v3 = vld [vmem:[%s3847_s1] sm:$0x7] }
 0x15b   :  { %2531 = vmatprep.subr.bf16.mxu0 %v2530_v11  ;;  %v348_v1 = vsub.s32 2, %v339_v63  ;;  %v340_v2 = vsub.s32 0, %v339_v63  ;;  %v344_v5 = vsub.s32 1, %v339_v63  ;;  %v2606_v63 = vpack.c.bf16 %v838_v62, %v837_v60  ;;  %v938_v60 = vld [vmem:[#allocation11 + $0x20] sm:$0xff] }
 0x15d   :  { %2562 = vmatpush3.bf16.msra.mxu1 %v2561_v7  ;;  %v349_v6 = vrot.slane %v336_v3, %v348_v1  ;;  %v341_v7 = vrot.slane %v336_v3, %v340_v2  ;;  %v345_v8 = vrot.slane %v336_v3, %v344_v5  ;;  %v839_v1 = vld [vmem:[#allocation8 + $0x20] sm:$0xff]  ;;  %v840_v2 = vld [vmem:[#allocation8 + $0x28] sm:$0xff] }
 0x15e   :  { %2563 = vmatprep.subr.bf16.mxu1 %v3224_v0  ;;  %2533 = vmatpush3.bf16.msra.mxu0 %v2532_v14  ;;  %v2609_v3 = vpack.c.bf16 %v840_v2, %v839_v1  ;;  %v941_v1 = vld [vmem:[#allocation11 + $0x38] sm:$0xff] }
 0x15f   :  { %2535 = vmatprep.subr.bf16.mxu0 %v2534_v20 }
 0x161   :  { %2565 = vmatpush3.bf16.msra.mxu1 %v2564_v17 }
 0x162   :  { %2566 = vmatprep.subr.bf16.mxu1 %v3224_v0  ;;  %2537 = vmatpush3.bf16.msra.mxu0 %v2536_v23 }
 0x163   :  { %2539 = vmatprep.subr.bf16.mxu0 %v2538_v29 }
 0x165   :  { %2568 = vmatpush3.bf16.msra.mxu1 %v2567_v26  ;;  %v736_v26 = vld [vmem:[#allocation7] sm:$0xff] }
 0x166   :  { %2569 = vmatprep.subr.bf16.mxu1 %v3224_v0  ;;  %2541 = vmatpush3.bf16.msra.mxu0 %v2540_v32  ;;  %v2579_v32 = vpack.c.bf16 %v737_v27, %v736_v26  ;;  %v846_v26 = vld [vmem:[#allocation8 + $0x58] sm:$0xff]  ;;  %v847_v27 = vld [vmem:[#allocation8 + $0x60] sm:$0xff] }
 0x167   :  { %2543 = vmatprep.subr.bf16.mxu0 %v2542_v39  ;;  %v741_v39 = vld [vmem:[#allocation7 + $0x28] sm:$0xff] }
 0x168   :  { %v2585_v40 = vpack.c.bf16 %v741_v39, %v740_v38  ;;  %v961_v38 = vld [vmem:[#allocation13 + $0x18] sm:$0xff] }
 0x169   :  { %2571 = vmatpush3.bf16.msra.mxu1 %v2570_v35  ;;  %v738_v35 = vld [vmem:[#allocation7 + $0x10] sm:$0xff] }
 0x16a   :  { %2572 = vmatprep.subr.bf16.mxu1 %v3224_v0  ;;  %2545 = vmatpush3.bf16.msra.mxu0 %v2544_v44  ;;  %v2582_v37 = vpack.c.bf16 %v739_v36, %v738_v35  ;;  %v2588_v44 = vpack.c.bf16 %v743_v42, %v742_v41  ;;  %v959_v35 = vld [vmem:[#allocation13 + $0x8] sm:$0xff] }
 0x16b   :  { %2547 = vmatprep.subr.bf16.mxu0 %v2546_v50  ;;  %v747_v50 = vld [vmem:[#allocation7 + $0x58] sm:$0xff]  ;;  %v963_v41 = vld [vmem:[#allocation13 + $0x28] sm:$0xff] }
 0x16c   :  { %v2594_v52 = vpack.c.bf16 %v747_v50, %v746_v49 }
 0x16d   :  { %2574 = vmatpush3.bf16.msra.mxu1 %v2573_v45  ;;  %v744_v45 = vld [vmem:[#allocation7 + $0x40] sm:$0xff] }
 0x16e   :  { %2575 = vmatprep.subr.bf16.mxu1 %v3224_v0  ;;  %2549 = vmatpush3.bf16.msra.mxu0 %v2548_v54  ;;  %v2591_v48 = vpack.c.bf16 %v745_v47, %v744_v45  ;;  %v2597_v54 = vpack.c.bf16 %v749_v53, %v748_v51  ;;  %v934_v51 = vld [vmem:[#allocation11] sm:$0xff] }
 0x16f   :  { %2551 = vmatprep.subr.bf16.mxu0 %v2550_v58  ;;  %v835_v58 = vld [vmem:[#allocation8] sm:$0xff] }
 0x171   :  { %2577 = vmatpush3.bf16.msra.mxu1 %v2576_v57  ;;  %v2600_v57 = vpack.c.bf16 %v751_v56, %v750_v55  ;;  %v936_v56 = vld [vmem:[#allocation11 + $0x10] sm:$0xff] }
 0x172   :  { %2602 = vmatprep.subr.bf16.mxu1 %v3224_v0  ;;  %2553 = vmatpush3.bf16.msra.mxu0 %v2552_v61  ;;  %v2603_v61 = vpack.c.bf16 %v836_v59, %v835_v58 }
 0x173   :  { %2578 = vmatprep.subr.bf16.mxu0 %v3224_v0 }
 0x227   :  { %v513_v10 = vpop.f32.mrb[0].mxu1 }
 0x228   :  { %v442_v11 = vpop.f32.mrb[0].mxu0  ;;  %v514_v12 = vadd.f32 %v513_v10, %v349_v6  ;;  %v515_v15 = vpop.f32.mrb[1].mxu1 }
 0x229   :  { %v443_v13 = vadd.f32 %v442_v11, %v341_v7  ;;  %v444_v14 = vpop.f32.mrb[1].mxu0 }
 0x22a   :  { %v445_v16 = vadd.f32 %v444_v14, %v345_v8  ;;  %v522_v17 = vmin.f32 %v514_v12, 0.0  ;;  %vm519_vm5 = vcmp.gt.f32.partialorder %v514_v12, 0.0  ;;  %v1841_v8 = vld [vmem:[%s3848_s5] ss:$0 sm:$0xff]  ;;  %s3228_s5 = smov [#allocation23]  }
 0x22b   :  { %v520_v18 = vmin.f32 %v443_v13, 0.0  ;;  %vm517_vm7 = vcmp.gt.f32.partialorder %v443_v13, 0.0  ;;  %s1813_s30 = sshll.u32 %s3228_s5, 4  ;;  %s1814_s30 = int_to_ptr.vmem [resolvable:$true] %s1813_s30 }
 0x22c   :  { %v521_v19 = vmin.f32 %v445_v16, 0.0  ;;  %v527_v20 = vmul.f32 1.442695, %v522_v17  ;;  %vm518_vm6 = vcmp.gt.f32.partialorder %v445_v16, 0.0  ;;  %s3169_s28 = scalar_lea.vmem %s1814_s30, 32  ;;  %p3174_p7 = scmp.lt.s32.totalorder %s1814_s30, %s1814_s30 }
 0x22d   :  { %v523_v21 = vmul.f32 1.442695, %v520_v18  ;;  %p3170_p6 = scmp.ne.s32.totalorder %s1814_s30, %s3169_s28  ;;  %p3175_p8 = scmp.lt.s32.totalorder %s3169_s28, %s3169_s28 }
 0x22e   :  { %v525_v22 = vmul.f32 1.442695, %v521_v19  ;;  %2859 = vpow2.f32 %v527_v20  ;;  %v841_v19 = vld [vmem:[#allocation8 + $0x30] sm:$0xff]  ;;  %v842_v20 = vld [vmem:[#allocation8 + $0x38] sm:$0xff] }
 0x22f   :  { %2861 = vpow2.f32 %v523_v21  ;;  %v2612_v21 = vpack.c.bf16 %v842_v20, %v841_v19  ;;  %v950_v19 = vld [vmem:[#allocation11 + $0x80] sm:$0xff]  ;;  %v951_v20 = vld [vmem:[#allocation11 + $0x88] sm:$0xff]  ;;  %p3176_p9 = por %p3175_p8, %p3174_p7 }
 0x230   :  { %2863 = vpow2.f32 %v525_v22  ;;  %v843_v22 = vld [vmem:[#allocation8 + $0x40] sm:$0xff] }
 0x231   :  { %p3177_p10 = pnand %p3176_p9, %p3170_p6 }
 0x238   :  { %v2860_v23 = vpop.eup %2859 }
 0x239   :  { %v2862_v24 = vpop.eup %2861  ;;  %v1840_v25 = vadd.f32 -1.0, %v2860_v23  ;;  %v844_v23 = vld [vmem:[#allocation8 + $0x48] sm:$0xff] }
 0x23a   :  { %v2864_v28 = vpop.eup %2863  ;;  %v1838_v29 = vadd.f32 -1.0, %v2862_v24  ;;  %v2615_v24 = vpack.c.bf16 %v844_v23, %v843_v22  ;;  %v966_v22 = vld [vmem:[#allocation13 + $0x40] sm:$0xff]  ;;  %v967_v23 = vld [vmem:[#allocation13 + $0x48] sm:$0xff] }
 0x23b   :  { %v534_v30 = vsel %vm519_vm5, %v514_v12, %v1840_v25  ;;  %v1839_v31 = vadd.f32 -1.0, %v2864_v28  ;;  %v845_v25 = vld [vmem:[#allocation8 + $0x50] sm:$0xff] }
 0x23c   :  { %2107 = vmatmul.mubr.f32.vlgmr.msra.gmra.mrb[2].mxu1 %v534_v30  ;;  %v532_v34 = vsel %vm517_vm7, %v443_v13, %v1838_v29  ;;  %v2618_v28 = vpack.c.bf16 %v846_v26, %v845_v25  ;;  %v848_v29 = vld [vmem:[#allocation8 + $0x68] sm:$0xff]  ;;  %v952_v25 = vld [vmem:[#allocation11 + $0x90] sm:$0xff]  ;;  %v953_v26 = vld [vmem:[#allocation11 + $0x98] sm:$0xff] }
 0x23d   :  { %v533_v33 = vsel %vm518_vm6, %v445_v16, %v1839_v31  ;;  %2176 = vmatprep.mubr.msk.f32.mxu1 %vm3226_vm4, %v3227_v43  ;;  %2604 = vmatpush3.bf16.msra.mxu1 %v2603_v61  ;;  %v2621_v30 = vpack.c.bf16 %v848_v29, %v847_v27  ;;  %v849_v31 = vld [vmem:[#allocation8 + $0x70] sm:$0xff]  ;;  %v2678_v27 = vpack.c.bf16 %v953_v26, %v952_v25  ;;  %v969_v29 = vld [vmem:[#allocation13 + $0x58] sm:$0xff] }
 0x23e   :  { %654 = vmatprep.mubr.f32.mxu0 %v533_v33  ;;  %2605 = vmatprep.subr.bf16.mxu1 %v3224_v0  ;;  %v939_v61 = vld [vmem:[#allocation11 + $0x28] sm:$0xff]  ;;  %v1849_v26 = vld [vmem:[%s3850_s0] ss:$0 sm:$0xff] }
 0x23f   :  { %655 = vmatmul.mubr.f32.vlgmr.msra.gmra.mrb[2].mxu0 %v532_v34  ;;  %v958_v34 = vld [vmem:[#allocation13] sm:$0xff]  ;;  %v2657_v62 = vpack.c.bf16 %v939_v61, %v938_v60 }
 0x240   :  { %2580 = vmatpush3.bf16.msra.mxu0 %v2579_v32  ;;  %2141 = vmatprep.mubr.msk.f32.mxu0 %vm3226_vm4, %v3227_v43  ;;  %v850_v32 = vld [vmem:[#allocation8 + $0x78] sm:$0xff]  ;;  %v2627_v36 = vpack.c.bf16 %v959_v35, %v958_v34  ;;  %v971_v34 = vld [vmem:[#allocation13 + $0x68] sm:$0xff] }
 0x241   :  { %2581 = vmatprep.subr.bf16.mxu0 %v3224_v0  ;;  %2607 = vmatpush3.bf16.msra.mxu1 %v2606_v63  ;;  %v2624_v33 = vpack.c.bf16 %v850_v32, %v849_v31  ;;  %v940_v63 = vld [vmem:[#allocation11 + $0x30] sm:$0xff]  ;;  %v955_v32 = vld [vmem:[#allocation11 + $0xa8] sm:$0xff] }
 0x242   :  { %2608 = vmatprep.subr.bf16.mxu1 %v3224_v0  ;;  %v2660_v2 = vpack.c.bf16 %v941_v1, %v940_v63  ;;  %v1137_v63 = vld [vmem:[#allocation14 + $0x30] sm:$0xff]  ;;  %v1138_v1 = vld [vmem:[#allocation14 + $0x38] sm:$0xff] }
 0x244   :  { %2583 = vmatpush3.bf16.msra.mxu0 %v2582_v37  ;;  %v960_v37 = vld [vmem:[#allocation13 + $0x10] sm:$0xff] }
 0x245   :  { %2584 = vmatprep.subr.bf16.mxu0 %v3224_v0  ;;  %2610 = vmatpush3.bf16.msra.mxu1 %v2609_v3  ;;  %v2630_v39 = vpack.c.bf16 %v961_v38, %v960_v37  ;;  %v942_v3 = vld [vmem:[#allocation11 + $0x40] sm:$0xff]  ;;  %v956_v37 = vld [vmem:[#allocation11 + $0xb0] sm:$0xff]  ;;  %v957_v38 = vld [vmem:[#allocation11 + $0xb8] sm:$0xf] }
 0x246   :  { %2611 = vmatprep.subr.bf16.mxu1 %v3224_v0 }
 0x248   :  { %2586 = vmatpush3.bf16.msra.mxu0 %v2585_v40  ;;  %v962_v40 = vld [vmem:[#allocation13 + $0x20] sm:$0xff] }
 0x249   :  { %2587 = vmatprep.subr.bf16.mxu0 %v3224_v0  ;;  %2613 = vmatpush3.bf16.msra.mxu1 %v2612_v21  ;;  %v2633_v42 = vpack.c.bf16 %v963_v41, %v962_v40  ;;  %v2675_v21 = vpack.c.bf16 %v951_v20, %v950_v19  ;;  %v973_v40 = vld [vmem:[#allocation13 + $0x78] sm:$0xff]  ;;  %v2684_v41 = vpack.c.bf16 %v957_v38, %v956_v37  ;;  %v1238_v38 = vld [vmem:[#allocation16 + $0x40] sm:$0xff] }
 0x24a   :  { %2614 = vmatprep.subr.bf16.mxu1 %v3224_v0  ;;  %v1233_v20 = vld [vmem:[#allocation16 + $0x18] sm:$0xff] }
 0x24c   :  { %2589 = vmatpush3.bf16.msra.mxu0 %v2588_v44  ;;  %v1843_v44 = vld [vmem:[%s3849_s15] ss:$0 sm:$0xff] }
 0x24d   :  { %2590 = vmatprep.subr.bf16.mxu0 %v3224_v0  ;;  %2616 = vmatpush3.bf16.msra.mxu1 %v2615_v24  ;;  %v2639_v24 = vpack.c.bf16 %v967_v23, %v966_v22  ;;  %v1234_v22 = vld [vmem:[#allocation16 + $0x20] sm:$0xff]  ;;  %v1235_v23 = vld [vmem:[#allocation16 + $0x28] sm:$0xff] }
 0x24e   :  { %2617 = vmatprep.subr.bf16.mxu1 %v3224_v0 }
 0x250   :  { %2592 = vmatpush3.bf16.msra.mxu0 %v2591_v48 }
 0x251   :  { %2593 = vmatprep.subr.bf16.mxu0 %v3224_v0  ;;  %2619 = vmatpush3.bf16.msra.mxu1 %v2618_v28  ;;  %v968_v28 = vld [vmem:[#allocation13 + $0x50] sm:$0xff] }
 0x252   :  { %2620 = vmatprep.subr.bf16.mxu1 %v3224_v0  ;;  %v2642_v31 = vpack.c.bf16 %v969_v29, %v968_v28 }
 0x254   :  { %2595 = vmatpush3.bf16.msra.mxu0 %v2594_v52  ;;  %v935_v52 = vld [vmem:[#allocation11 + $0x8] sm:$0xff] }
 0x255   :  { %2596 = vmatprep.subr.bf16.mxu0 %v3224_v0  ;;  %2622 = vmatpush3.bf16.msra.mxu1 %v2621_v30  ;;  %v2651_v55 = vpack.c.bf16 %v935_v52, %v934_v51  ;;  %v954_v30 = vld [vmem:[#allocation11 + $0xa0] sm:$0xff] }
 0x256   :  { %2623 = vmatprep.subr.bf16.mxu1 %v3224_v0  ;;  %v2681_v35 = vpack.c.bf16 %v955_v32, %v954_v30  ;;  %v1131_v51 = vld [vmem:[#allocation14] sm:$0xff] }
 0x258   :  { %2598 = vmatpush3.bf16.msra.mxu0 %v2597_v54 }
 0x259   :  { %2599 = vmatprep.subr.bf16.mxu0 %v3224_v0  ;;  %2625 = vmatpush3.bf16.msra.mxu1 %v2624_v33  ;;  %v970_v33 = vld [vmem:[#allocation13 + $0x60] sm:$0xff] }
 0x25a   :  { %2650 = vmatprep.subr.bf16.mxu1 %v3224_v0 }
 0x25c   :  { %2601 = vmatpush3.bf16.msra.mxu0 %v2600_v57  ;;  %v937_v57 = vld [vmem:[#allocation11 + $0x18] sm:$0xff] }
 0x25d   :  { %2626 = vmatprep.subr.bf16.mxu0 %v3224_v0  ;;  %v2654_v59 = vpack.c.bf16 %v937_v57, %v936_v56  ;;  %v1134_v56 = vld [vmem:[#allocation14 + $0x18] sm:$0xff] }
 0x30f   :  { %v726_v5 = vpop.f32.mrb[2].mxu1 }
 0x310   :  { %v2108_v6 = vpop.f32.mrb[3].mxu1 }
 0x312   :  { %v1896_v7 = vpop.f32.mrb[2].mxu0 }
 0x313   :  { %v1897_v10 = vpop.f32.mrb[3].mxu0 }
 0x314   :  { %v1898_v11 = vadd.f32 %v1897_v10, %v1896_v7  ;;  %v945_v7 = vld [vmem:[#allocation11 + $0x58] sm:$0xff]  ;;  %v946_v10 = vld [vmem:[#allocation11 + $0x60] sm:$0xff] }
 0x316   :  { %v657_v12 = vadd.f32 %v1898_v11, %v1841_v8  ;;  %v947_v11 = vld [vmem:[#allocation11 + $0x68] sm:$0xff] }
 0x318   :  { %v727_v13 = vadd.f32 %v726_v5, %v657_v12  ;;  %v943_v5 = vld [vmem:[#allocation11 + $0x48] sm:$0xff]  ;;  %v2669_v12 = vpack.c.bf16 %v947_v11, %v946_v10 }
 0x319   :  { %v2663_v6 = vpack.c.bf16 %v943_v5, %v942_v3  ;;  %v1139_v3 = vld [vmem:[#allocation14 + $0x40] sm:$0xff]  ;;  %v1140_v5 = vld [vmem:[#allocation14 + $0x48] sm:$0xff] }
 0x31a   :  { %v731_v14 = vmin.f32 %v727_v13, 0.0  ;;  %vm730_vm8 = vcmp.gt.f32.partialorder %v727_v13, 0.0  ;;  %v1144_v11 = vld [vmem:[#allocation14 + $0x68] sm:$0xff] }
 0x31c   :  { %v732_v15 = vmul.f32 1.442695, %v731_v14  ;;  %v949_v14 = vld [vmem:[#allocation11 + $0x78] sm:$0xff] }
 0x31e   :  { %2865 = vpow2.f32 %v732_v15 }
 0x328   :  { %v2866_v16 = vpop.eup %2865 }
 0x329   :  { %v1842_v17 = vadd.f32 -1.0, %v2866_v16  ;;  %v964_v16 = vld [vmem:[#allocation13 + $0x30] sm:$0xff] }
 0x32b   :  { %v735_v18 = vsel %vm730_vm8, %v727_v13, %v1842_v17  ;;  %v948_v13 = vld [vmem:[#allocation11 + $0x70] sm:$0xff]  ;;  %v965_v17 = vld [vmem:[#allocation13 + $0x38] sm:$0xff] }
 0x32c   :  { %2142 = vmatmul.mubr.f32.vlgmr.msra.gmra.mrb[4].mxu0 %v735_v18  ;;  %v2672_v15 = vpack.c.bf16 %v949_v14, %v948_v13  ;;  %v2636_v18 = vpack.c.bf16 %v965_v17, %v964_v16  ;;  %v1145_v13 = vld [vmem:[#allocation14 + $0x70] sm:$0xff]  ;;  %v1146_v14 = vld [vmem:[#allocation14 + $0x78] sm:$0xff]  ;;  %v1230_v16 = vld [vmem:[#allocation16] sm:$0xff] }
 0x32d   :  { %2211 = vmatprep.mubr.msk.f32.mxu0 %vm3226_vm4, %v3227_v43  ;;  %2628 = vmatpush3.bf16.msra.mxu0 %v2627_v36  ;;  %v2645_v36 = vpack.c.bf16 %v971_v34, %v970_v33  ;;  %v1231_v17 = vld [vmem:[#allocation16 + $0x8] sm:$0xff] }
 0x32e   :  { %2629 = vmatprep.subr.bf16.mxu0 %v3224_v0  ;;  %v2712_v19 = vpack.c.bf16 %v1231_v17, %v1230_v16  ;;  %v1342_v16 = vld [vmem:[#allocation17 + $0x68] sm:$0xff] }
 0x331   :  { %2631 = vmatpush3.bf16.msra.mxu0 %v2630_v39  ;;  %v972_v39 = vld [vmem:[#allocation13 + $0x70] sm:$0xff] }
 0x332   :  { %2632 = vmatprep.subr.bf16.mxu0 %v3224_v0 }
 0x335   :  { %2634 = vmatpush3.bf16.msra.mxu0 %v2633_v42  ;;  %v2648_v42 = vpack.c.bf16 %v973_v40, %v972_v39  ;;  %v1239_v39 = vld [vmem:[#allocation16 + $0x48] sm:$0xff] }
 0x336   :  { %2635 = vmatprep.subr.bf16.mxu0 %v3224_v0  ;;  %v2724_v40 = vpack.c.bf16 %v1239_v39, %v1238_v38  ;;  %v1423_v39 = vld [vmem:[%s3851_s17] sm:$0x3] }
 0x339   :  { %2637 = vmatpush3.bf16.msra.mxu0 %v2636_v18  ;;  %v1232_v18 = vld [vmem:[#allocation16 + $0x10] sm:$0xff] }
 0x33a   :  { %2638 = vmatprep.subr.bf16.mxu0 %v3224_v0 }
 0x33d   :  { %2640 = vmatpush3.bf16.msra.mxu0 %v2639_v24  ;;  %v2718_v24 = vpack.c.bf16 %v1235_v23, %v1234_v22  ;;  %v1516_v22 = vld [vmem:[#allocation19 + $0x8] sm:$0xff] }
 0x33e   :  { %2641 = vmatprep.subr.bf16.mxu0 %v3224_v0 }
 0x341   :  { %2643 = vmatpush3.bf16.msra.mxu0 %v2642_v31 }
 0x342   :  { %2644 = vmatprep.subr.bf16.mxu0 %v3224_v0 }
 0x345   :  { %2646 = vmatpush3.bf16.msra.mxu0 %v2645_v36  ;;  %v1237_v36 = vld [vmem:[#allocation16 + $0x38] sm:$0xff] }
 0x346   :  { %2647 = vmatprep.subr.bf16.mxu0 %v3224_v0 }
 0x349   :  { %2649 = vmatpush3.bf16.msra.mxu0 %v2648_v42  ;;  %v1241_v42 = vld [vmem:[#allocation16 + $0x58] sm:$0xff] }
 0x34a   :  { %2687 = vmatprep.subr.bf16.mxu0 %v3224_v0 }
 0x3ff   :  { %v825_v45 = vpop.f32.mrb[4].mxu0 }
 0x400   :  { %v826_v47 = vadd.f32 %v1843_v44, %v825_v45  ;;  %v2143_v48 = vpop.f32.mrb[5].mxu0  ;;  %v1845_v44 = vld [vmem:[#allocation10] ss:$0 sm:$0xff] }
 0x402   :  { %v830_v49 = vmin.f32 %v826_v47, 0.0  ;;  %vm829_vm9 = vcmp.gt.f32.partialorder %v826_v47, 0.0 }
 0x404   :  { %v831_v50 = vmul.f32 1.442695, %v830_v49 }
 0x406   :  { %2867 = vpow2.f32 %v831_v50 }
 0x410   :  { %v2868_v53 = vpop.eup %2867 }
 0x411   :  { %v1844_v54 = vadd.f32 -1.0, %v2868_v53 }
 0x413   :  { %v834_v58 = vsel %vm829_vm9, %v826_v47, %v1844_v54  ;;  %v2688_v54 = vpack.c.bf16 %v1132_v46, %v1131_v51  ;;  %v1329_v46 = vld [vmem:[#allocation17] sm:$0xff] }
 0x414   :  { %2177 = vmatmul.mubr.f32.vlgmr.msra.gmra.mrb[4].mxu1 %v834_v58  ;;  %v1135_v58 = vld [vmem:[#allocation14 + $0x20] sm:$0xff] }
 0x415   :  { %2652 = vmatpush1.bf16.msra.mxu1 %v2651_v55  ;;  %1848 = vmatprep.mubr.msk.f32.mxu1 %vm363_vm0, %v3577_v9  ;;  %v944_v9 = vld [vmem:[#allocation11 + $0x50] sm:$0xff] }
 0x416   :  { %2653 = vmatprep.subr.bf16.mxu1 %v3224_v0  ;;  %v2666_v8 = vpack.c.bf16 %v945_v7, %v944_v9  ;;  %v1133_v55 = vld [vmem:[#allocation14 + $0x10] sm:$0xff]  ;;  %v1142_v7 = vld [vmem:[#allocation14 + $0x58] sm:$0xff] }
 0x417   :  { %v1141_v9 = vld [vmem:[#allocation14 + $0x50] sm:$0xff] }
 0x418   :  { %v2703_v10 = vpack.c.bf16 %v1142_v7, %v1141_v9  ;;  %v1336_v9 = vld [vmem:[#allocation17 + $0x38] sm:$0xff] }
 0x419   :  { %2655 = vmatpush1.bf16.msra.mxu1 %v2654_v59  ;;  %v1136_v59 = vld [vmem:[#allocation14 + $0x28] sm:$0xff] }
 0x41a   :  { %2656 = vmatprep.subr.bf16.mxu1 %v3224_v0  ;;  %v2694_v60 = vpack.c.bf16 %v1136_v59, %v1135_v58  ;;  %v1851_v59 = vld [vmem:[%s3798_s14] ss:$0 sm:$0xff] }
 0x41d   :  { %2658 = vmatpush1.bf16.msra.mxu1 %v2657_v62 }
 0x41e   :  { %2659 = vmatprep.subr.bf16.mxu1 %v3224_v0 }
 0x421   :  { %2661 = vmatpush1.bf16.msra.mxu1 %v2660_v2  ;;  %v2697_v2 = vpack.c.bf16 %v1138_v1, %v1137_v63 }
 0x422   :  { %2662 = vmatprep.subr.bf16.mxu1 %v3224_v0 }
 0x425   :  { %2664 = vmatpush1.bf16.msra.mxu1 %v2663_v6  ;;  %v2700_v6 = vpack.c.bf16 %v1140_v5, %v1139_v3 }
 0x426   :  { %2665 = vmatprep.subr.bf16.mxu1 %v3224_v0 }
 0x429   :  { %2667 = vmatpush1.bf16.msra.mxu1 %v2666_v8  ;;  %v1143_v8 = vld [vmem:[#allocation14 + $0x60] sm:$0xff] }
 0x42a   :  { %2668 = vmatprep.subr.bf16.mxu1 %v3224_v0 }
 0x42d   :  { %2670 = vmatpush1.bf16.msra.mxu1 %v2669_v12  ;;  %v2706_v12 = vpack.c.bf16 %v1144_v11, %v1143_v8  ;;  %v1337_v8 = vld [vmem:[#allocation17 + $0x40] sm:$0xff] }
 0x42e   :  { %2671 = vmatprep.subr.bf16.mxu1 %v3224_v0 }
 0x431   :  { %2673 = vmatpush1.bf16.msra.mxu1 %v2672_v15  ;;  %v2709_v15 = vpack.c.bf16 %v1146_v14, %v1145_v13  ;;  %v1340_v13 = vld [vmem:[#allocation17 + $0x58] sm:$0xff] }
 0x432   :  { %2674 = vmatprep.subr.bf16.mxu1 %v3224_v0 }
 0x435   :  { %2676 = vmatpush1.bf16.msra.mxu1 %v2675_v21  ;;  %v2715_v21 = vpack.c.bf16 %v1233_v20, %v1232_v18  ;;  %v1343_v18 = vld [vmem:[#allocation17 + $0x70] sm:$0xff] }
 0x436   :  { %2677 = vmatprep.subr.bf16.mxu1 %v3224_v0 }
 0x439   :  { %2679 = vmatpush1.bf16.msra.mxu1 %v2678_v27 }
 0x43a   :  { %2680 = vmatprep.subr.bf16.mxu1 %v3224_v0 }
 0x43d   :  { %2682 = vmatpush1.bf16.msra.mxu1 %v2681_v35  ;;  %v1236_v35 = vld [vmem:[#allocation16 + $0x30] sm:$0xff] }
 0x43e   :  { %2683 = vmatprep.subr.bf16.mxu1 %v3224_v0  ;;  %v2721_v37 = vpack.c.bf16 %v1237_v36, %v1236_v35  ;;  %v1426_v35 = vld [vmem:[%s3803_s19 + $0x10] sm:$0xff]  ;;  %v1427_v36 = vld [vmem:[%s3803_s19 + $0x18] sm:$0xff] }
 0x43f   :  { %v2763_v38 = vpack.c.bf16 %v1427_v36, %v1426_v35  ;;  %v1713_v35 = vld [vmem:[#allocation22] sm:$0xff]  ;;  %v1714_v36 = vld [vmem:[#allocation22 + $0x8] sm:$0xff] }
 0x441   :  { %2686 = vmatpush1.bf16.msk.msra.mxu1 %vm3587_vm3, %v2684_v41  ;;  %v1240_v41 = vld [vmem:[#allocation16 + $0x50] sm:$0xff] }
 0x442   :  { %2711 = vmatprep.subr.bf16.mxu1 %v3224_v0 }
 0x444   :  { %1112 = vmatmul.mubr.f32.vlgmr.msra.gmra.mrb[6].mxu1 %v3572_v4  ;;  %v2691_v4 = vpack.c.bf16 %v1134_v56, %v1133_v55  ;;  %v1332_v55 = vld [vmem:[#allocation17 + $0x18] sm:$0xff] }
 0x445   :  { %2281 = vmatprep.mubr.msk.f32.mxu1 %vm3226_vm4, %v3227_v43  ;;  %2713 = vmatpush3.bf16.msra.mxu1 %v2712_v19  ;;  %v1344_v19 = vld [vmem:[#allocation17 + $0x78] sm:$0xff] }
 0x446   :  { %2714 = vmatprep.subr.bf16.mxu1 %v3224_v0  ;;  %v2757_v20 = vpack.c.bf16 %v1344_v19, %v1343_v18 }
 0x449   :  { %2716 = vmatpush3.bf16.msra.mxu1 %v2715_v21  ;;  %v1515_v21 = vld [vmem:[#allocation19] sm:$0xff] }
 0x44a   :  { %2717 = vmatprep.subr.bf16.mxu1 %v3224_v0  ;;  %v2766_v23 = vpack.c.bf16 %v1516_v22, %v1515_v21  ;;  %v1620_v21 = vld [vmem:[#allocation20 + $0x30] sm:$0xff]  ;;  %v1621_v22 = vld [vmem:[#allocation20 + $0x38] sm:$0xff] }
 0x44d   :  { %2719 = vmatpush3.bf16.msra.mxu1 %v2718_v24  ;;  %v1853_v24 = vld [vmem:[%s3800_s16] ss:$0 sm:$0xff] }
 0x44e   :  { %2720 = vmatprep.subr.bf16.mxu1 %v3224_v0 }
 0x451   :  { %2722 = vmatpush3.bf16.msra.mxu1 %v2721_v37 }
 0x452   :  { %2723 = vmatprep.subr.bf16.mxu1 %v3224_v0 }
 0x455   :  { %2725 = vmatpush3.bf16.msra.mxu1 %v2724_v40  ;;  %v1517_v40 = vld [vmem:[#allocation19 + $0x10] sm:$0xff] }
 0x456   :  { %2726 = vmatprep.subr.bf16.mxu1 %v3224_v0 }
 0x4e7   :  { %v924_v45 = vpop.f32.mrb[4].mxu1 }
 0x4e8   :  { %v925_v47 = vadd.f32 %v1845_v44, %v924_v45  ;;  %v2178_v48 = vpop.f32.mrb[5].mxu1  ;;  %v1242_v44 = vld [vmem:[#allocation16 + $0x60] sm:$0xff]  ;;  %v2727_v45 = vpack.c.bf16 %v1241_v42, %v1240_v41  ;;  %v1518_v41 = vld [vmem:[#allocation19 + $0x18] sm:$0xff] }
 0x4e9   :  { %v2769_v42 = vpack.c.bf16 %v1518_v41, %v1517_v40  ;;  %v1717_v41 = vld [vmem:[#allocation22 + $0x20] sm:$0xff] }
 0x4ea   :  { %v929_v49 = vmin.f32 %v925_v47, 0.0  ;;  %vm928_vm10 = vcmp.gt.f32.partialorder %v925_v47, 0.0  ;;  %2728 = vmatpush3.bf16.msra.mxu1 %v2727_v45  ;;  %v1520_v45 = vld [vmem:[#allocation19 + $0x28] sm:$0xff] }
 0x4eb   :  { %2729 = vmatprep.subr.bf16.mxu1 %v3224_v0 }
 0x4ec   :  { %v930_v50 = vmul.f32 1.442695, %v929_v49  ;;  %v1244_v49 = vld [vmem:[#allocation16 + $0x70] sm:$0xff] }
 0x4ee   :  { %2869 = vpow2.f32 %v930_v50  ;;  %v1245_v50 = vld [vmem:[#allocation16 + $0x78] sm:$0xff] }
 0x4ef   :  { %v2733_v51 = vpack.c.bf16 %v1245_v50, %v1244_v49  ;;  %v1522_v49 = vld [vmem:[#allocation19 + $0x38] sm:$0xff] }
 0x4f8   :  { %v2870_v52 = vpop.eup %2869 }
 0x4f9   :  { %v1846_v53 = vadd.f32 -1.0, %v2870_v52  ;;  %v1330_v52 = vld [vmem:[#allocation17 + $0x8] sm:$0xff] }
 0x4fb   :  { %v933_v57 = vsel %vm928_vm10, %v925_v47, %v1846_v53  ;;  %v1243_v47 = vld [vmem:[#allocation16 + $0x68] sm:$0xff]  ;;  %v1331_v53 = vld [vmem:[#allocation17 + $0x10] sm:$0xff] }
 0x4fc   :  { %2212 = vmatmul.mubr.f32.vlgmr.msra.gmra.mrb[6].mxu0 %v933_v57  ;;  %v2730_v48 = vpack.c.bf16 %v1243_v47, %v1242_v44  ;;  %v2739_v56 = vpack.c.bf16 %v1332_v55, %v1331_v53  ;;  %v1333_v57 = vld [vmem:[#allocation17 + $0x20] sm:$0xff]  ;;  %v1525_v53 = vld [vmem:[#allocation19 + $0x50] sm:$0xff] }
 0x4fd   :  { %2689 = vmatpush3.bf16.msra.mxu0 %v2688_v54  ;;  %2246 = vmatprep.mubr.msk.f32.mxu0 %vm3226_vm4, %v3227_v43  ;;  %v2736_v54 = vpack.c.bf16 %v1330_v52, %v1329_v46  ;;  %v1519_v44 = vld [vmem:[#allocation19 + $0x20] sm:$0xff]  ;;  %v1524_v46 = vld [vmem:[#allocation19 + $0x48] sm:$0xff] }
 0x4fe   :  { %2690 = vmatprep.subr.bf16.mxu0 %v3224_v0  ;;  %2731 = vmatpush3.bf16.msra.mxu1 %v2730_v48  ;;  %v2772_v47 = vpack.c.bf16 %v1520_v45, %v1519_v44  ;;  %v1521_v48 = vld [vmem:[#allocation19 + $0x30] sm:$0xff]  ;;  %v1527_v55 = vld [vmem:[#allocation19 + $0x60] sm:$0xff]  ;;  %v1859_v45 = vld [vmem:[%s3806_s22] ss:$0 sm:$0xff] }
 0x4ff   :  { %2732 = vmatprep.subr.bf16.mxu1 %v3224_v0  ;;  %v2775_v50 = vpack.c.bf16 %v1522_v49, %v1521_v48 }
 0x501   :  { %2692 = vmatpush3.bf16.msra.mxu0 %v2691_v4  ;;  %v1334_v4 = vld [vmem:[#allocation17 + $0x28] sm:$0xff] }
 0x502   :  { %2693 = vmatprep.subr.bf16.mxu0 %v3224_v0  ;;  %2734 = vmatpush3.bf16.msra.mxu1 %v2733_v51  ;;  %v2742_v58 = vpack.c.bf16 %v1334_v4, %v1333_v57  ;;  %v1523_v51 = vld [vmem:[#allocation19 + $0x40] sm:$0xff]  ;;  %v1528_v57 = vld [vmem:[#allocation19 + $0x68] sm:$0xff] }
 0x503   :  { %2765 = vmatprep.subr.bf16.mxu1 %v3224_v0  ;;  %v2778_v52 = vpack.c.bf16 %v1524_v46, %v1523_v51  ;;  %v2784_v4 = vpack.c.bf16 %v1528_v57, %v1527_v55  ;;  %v1720_v55 = vld [vmem:[#allocation22 + $0x38] sm:$0xff]  ;;  %v1721_v57 = vld [vmem:[#allocation22 + $0x40] sm:$0xff] }
 0x505   :  { %2695 = vmatpush3.bf16.msra.mxu0 %v2694_v60 }
 0x506   :  { %2696 = vmatprep.subr.bf16.mxu0 %v3224_v0 }
 0x509   :  { %2698 = vmatpush3.bf16.msra.mxu0 %v2697_v2 }
 0x50a   :  { %2699 = vmatprep.subr.bf16.mxu0 %v3224_v0 }
 0x50d   :  { %2701 = vmatpush3.bf16.msra.mxu0 %v2700_v6  ;;  %v1335_v6 = vld [vmem:[#allocation17 + $0x30] sm:$0xff] }
 0x50e   :  { %2702 = vmatprep.subr.bf16.mxu0 %v3224_v0  ;;  %v2745_v7 = vpack.c.bf16 %v1336_v9, %v1335_v6  ;;  %v1619_v6 = vld [vmem:[#allocation20 + $0x28] sm:$0xff] }
 0x511   :  { %2704 = vmatpush3.bf16.msra.mxu0 %v2703_v10  ;;  %v1338_v10 = vld [vmem:[#allocation17 + $0x48] sm:$0xff] }
 0x512   :  { %2705 = vmatprep.subr.bf16.mxu0 %v3224_v0  ;;  %v2748_v11 = vpack.c.bf16 %v1338_v10, %v1337_v8 }
 0x515   :  { %2707 = vmatpush3.bf16.msra.mxu0 %v2706_v12  ;;  %v1339_v12 = vld [vmem:[#allocation17 + $0x50] sm:$0xff] }
 0x516   :  { %2708 = vmatprep.subr.bf16.mxu0 %v3224_v0  ;;  %v2751_v14 = vpack.c.bf16 %v1340_v13, %v1339_v12  ;;  %v1856_v12 = vld [vmem:[%s3804_s20] ss:$0 sm:$0xff] }
 0x517   :  { %v1113_v61 = vpop.f32.mrb[6].mxu1 }
 0x518   :  { %v1115_v62 = vpop.f32.mrb[7].mxu1 }
 0x519   :  { %2710 = vmatpush3.bf16.msra.mxu0 %v2709_v15  ;;  %v1341_v15 = vld [vmem:[#allocation17 + $0x60] sm:$0xff] }
 0x51a   :  { %2735 = vmatprep.subr.bf16.mxu0 %v3224_v0  ;;  %v2754_v17 = vpack.c.bf16 %v1342_v16, %v1341_v15 }
 0x5cf   :  { %v1040_v25 = vpop.f32.mrb[6].mxu0 }
 0x5d0   :  { %v1114_v27 = vadd.f32 %v1113_v61, %v1040_v25  ;;  %v2213_v28 = vpop.f32.mrb[7].mxu0 }
 0x5d2   :  { %v1124_v29 = vadd.f32 %v1849_v26, %v1114_v27 }
 0x5d4   :  { %v1126_v30 = vmin.f32 %v1124_v29, 0.0  ;;  %vm1125_vm11 = vcmp.gt.f32.partialorder %v1124_v29, 0.0 }
 0x5d6   :  { %v1127_v31 = vmul.f32 1.442695, %v1126_v30  ;;  %v1424_v30 = vld [vmem:[%s3803_s19] sm:$0xff] }
 0x5d8   :  { %2871 = vpow2.f32 %v1127_v31  ;;  %v1425_v31 = vld [vmem:[%s3803_s19 + $0x8] sm:$0xff] }
 0x5e2   :  { %v2872_v32 = vpop.eup %2871 }
 0x5e3   :  { %v1850_v33 = vadd.f32 -1.0, %v2872_v32 }
 0x5e5   :  { %v1130_v34 = vsel %vm1125_vm11, %v1124_v29, %v1850_v33 }
 0x5e6   :  { %2247 = vmatmul.mubr.f32.vlgmr.msra.gmra.mrb[8].mxu0 %v1130_v34  ;;  %v2760_v34 = vpack.c.bf16 %v1425_v31, %v1424_v30  ;;  %v1627_v31 = vld [vmem:[#allocation20 + $0x68] sm:$0xff] }
 0x5e7   :  { %2316 = vmatprep.mubr.msk.f32.mxu0 %vm3226_vm4, %v3227_v43  ;;  %2737 = vmatpush3.bf16.msra.mxu0 %v2736_v54  ;;  %v1526_v54 = vld [vmem:[#allocation19 + $0x58] sm:$0xff] }
 0x5e8   :  { %2738 = vmatprep.subr.bf16.mxu0 %v3224_v0 }
 0x5eb   :  { %2740 = vmatpush3.bf16.msra.mxu0 %v2739_v56  ;;  %v2781_v56 = vpack.c.bf16 %v1526_v54, %v1525_v53  ;;  %v1719_v54 = vld [vmem:[#allocation22 + $0x30] sm:$0xff] }
 0x5ec   :  { %2741 = vmatprep.subr.bf16.mxu0 %v3224_v0 }
 0x5ef   :  { %2743 = vmatpush3.bf16.msra.mxu0 %v2742_v58  ;;  %v1529_v58 = vld [vmem:[#allocation19 + $0x70] sm:$0xff] }
 0x5f0   :  { %2744 = vmatprep.subr.bf16.mxu0 %v3224_v0 }
 0x5f3   :  { %2746 = vmatpush3.bf16.msra.mxu0 %v2745_v7  ;;  %v1855_v7 = vld [vmem:[%s3802_s18] ss:$0 sm:$0xff] }
 0x5f4   :  { %2747 = vmatprep.subr.bf16.mxu0 %v3224_v0 }
 0x5f7   :  { %2749 = vmatpush3.bf16.msra.mxu0 %v2748_v11 }
 0x5f8   :  { %2750 = vmatprep.subr.bf16.mxu0 %v3224_v0 }
 0x5fb   :  { %2752 = vmatpush3.bf16.msra.mxu0 %v2751_v14 }
 0x5fc   :  { %2753 = vmatprep.subr.bf16.mxu0 %v3224_v0 }
 0x5ff   :  { %2755 = vmatpush3.bf16.msra.mxu0 %v2754_v17 }
 0x600   :  { %2756 = vmatprep.subr.bf16.mxu0 %v3224_v0 }
 0x603   :  { %2758 = vmatpush3.bf16.msra.mxu0 %v2757_v20 }
 0x604   :  { %2759 = vmatprep.subr.bf16.mxu0 %v3224_v0 }
 0x6b9   :  { %v1220_v60 = vpop.f32.mrb[8].mxu0 }
 0x6ba   :  { %v1221_v61 = vadd.f32 %v1851_v59, %v1220_v60  ;;  %v2248_v62 = vpop.f32.mrb[9].mxu0  ;;  %v1530_v59 = vld [vmem:[#allocation19 + $0x78] sm:$0xff] }
 0x6bb   :  { %v2787_v60 = vpack.c.bf16 %v1530_v59, %v1529_v58  ;;  %v1615_v62 = vld [vmem:[#allocation20 + $0x8] sm:$0xff]  ;;  %v1723_v59 = vld [vmem:[#allocation22 + $0x50] sm:$0xff] }
 0x6bc   :  { %v1225_v63 = vmin.f32 %v1221_v61, 0.0  ;;  %vm1224_vm12 = vcmp.gt.f32.partialorder %v1221_v61, 0.0 }
 0x6be   :  { %v1226_v1 = vmul.f32 1.442695, %v1225_v63  ;;  %v1616_v63 = vld [vmem:[#allocation20 + $0x10] sm:$0xff] }
 0x6c0   :  { %2873 = vpow2.f32 %v1226_v1 }
 0x6ca   :  { %v2874_v2 = vpop.eup %2873 }
 0x6cb   :  { %v1852_v3 = vadd.f32 -1.0, %v2874_v2  ;;  %v1617_v2 = vld [vmem:[#allocation20 + $0x18] sm:$0xff] }
 0x6cd   :  { %v1229_v5 = vsel %vm1224_vm12, %v1221_v61, %v1852_v3  ;;  %v1614_v61 = vld [vmem:[#allocation20] sm:$0xff]  ;;  %v2793_v3 = vpack.c.bf16 %v1617_v2, %v1616_v63  ;;  %v1726_v63 = vld [vmem:[#allocation22 + $0x68] sm:$0xff]  ;;  %v1727_v2 = vld [vmem:[#allocation22 + $0x70] sm:$0xff] }
 0x6ce   :  { %2282 = vmatmul.mubr.f32.vlgmr.msra.gmra.mrb[8].mxu1 %v1229_v5  ;;  %v2790_v1 = vpack.c.bf16 %v1615_v62, %v1614_v61  ;;  %v1618_v5 = vld [vmem:[#allocation20 + $0x20] sm:$0xff] }
 0x6cf   :  { %2362 = vmatprep.mubr.msk.f32.mxu1 %vm3226_vm4, %v3227_v43  ;;  %2767 = vmatpush3.bf16.msra.mxu1 %v2766_v23  ;;  %v2796_v9 = vpack.c.bf16 %v1619_v6, %v1618_v5  ;;  %v2799_v23 = vpack.c.bf16 %v1621_v22, %v1620_v21  ;;  %v1725_v61 = vld [vmem:[#allocation22 + $0x60] sm:$0xff]  ;;  %v1861_v6 = vld [vmem:[%s3808_s24] ss:$0 sm:$0xff] }
 0x6d0   :  { %2768 = vmatprep.subr.bf16.mxu1 %v3224_v0 }
 0x6d3   :  { %2770 = vmatpush3.bf16.msra.mxu1 %v2769_v42  ;;  %v1718_v42 = vld [vmem:[#allocation22 + $0x28] sm:$0xff] }
 0x6d4   :  { %2771 = vmatprep.subr.bf16.mxu1 %v3224_v0  ;;  %v2820_v44 = vpack.c.bf16 %v1718_v42, %v1717_v41 }
 0x6d7   :  { %2773 = vmatpush3.bf16.msra.mxu1 %v2772_v47 }
 0x6d8   :  { %2774 = vmatprep.subr.bf16.mxu1 %v3224_v0 }
 0x6db   :  { %2776 = vmatpush3.bf16.msra.mxu1 %v2775_v50 }
 0x6dc   :  { %2777 = vmatprep.subr.bf16.mxu1 %v3224_v0 }
 0x6df   :  { %2779 = vmatpush3.bf16.msra.mxu1 %v2778_v52 }
 0x6e0   :  { %2780 = vmatprep.subr.bf16.mxu1 %v3224_v0 }
 0x6e3   :  { %2782 = vmatpush3.bf16.msra.mxu1 %v2781_v56  ;;  %v2823_v56 = vpack.c.bf16 %v1720_v55, %v1719_v54 }
 0x6e4   :  { %2783 = vmatprep.subr.bf16.mxu1 %v3224_v0 }
 0x6e7   :  { %2785 = vmatpush3.bf16.msra.mxu1 %v2784_v4  ;;  %v1722_v4 = vld [vmem:[#allocation22 + $0x48] sm:$0xff] }
 0x6e8   :  { %2786 = vmatprep.subr.bf16.mxu1 %v3224_v0  ;;  %v2826_v58 = vpack.c.bf16 %v1722_v4, %v1721_v57 }
 0x6eb   :  { %2788 = vmatpush3.bf16.msra.mxu1 %v2787_v60  ;;  %v1724_v60 = vld [vmem:[#allocation22 + $0x58] sm:$0xff] }
 0x6ec   :  { %2813 = vmatprep.subr.bf16.mxu1 %v3224_v0  ;;  %v2829_v62 = vpack.c.bf16 %v1724_v60, %v1723_v59 }
 0x7a1   :  { %v1319_v25 = vpop.f32.mrb[8].mxu1 }
 0x7a2   :  { %v1320_v26 = vadd.f32 %v1853_v24, %v1319_v25  ;;  %v2283_v27 = vpop.f32.mrb[9].mxu1  ;;  %v1622_v24 = vld [vmem:[#allocation20 + $0x40] sm:$0xff]  ;;  %v1623_v25 = vld [vmem:[#allocation20 + $0x48] sm:$0xff] }
 0x7a3   :  { %v1624_v27 = vld [vmem:[#allocation20 + $0x50] sm:$0xff] }
 0x7a4   :  { %v1324_v28 = vmin.f32 %v1320_v26, 0.0  ;;  %vm1323_vm13 = vcmp.gt.f32.partialorder %v1320_v26, 0.0 }
 0x7a6   :  { %v1325_v29 = vmul.f32 1.442695, %v1324_v28  ;;  %v1625_v28 = vld [vmem:[#allocation20 + $0x58] sm:$0xff] }
 0x7a7   :  { %v2805_v30 = vpack.c.bf16 %v1625_v28, %v1624_v27 }
 0x7a8   :  { %2875 = vpow2.f32 %v1325_v29  ;;  %v1626_v29 = vld [vmem:[#allocation20 + $0x60] sm:$0xff] }
 0x7b2   :  { %v2876_v32 = vpop.eup %2875 }
 0x7b3   :  { %v1854_v33 = vadd.f32 -1.0, %v2876_v32  ;;  %v2808_v32 = vpack.c.bf16 %v1627_v31, %v1626_v29 }
 0x7b5   :  { %v1328_v37 = vsel %vm1323_vm13, %v1320_v26, %v1854_v33  ;;  %v2802_v26 = vpack.c.bf16 %v1623_v25, %v1622_v24  ;;  %v1629_v33 = vld [vmem:[#allocation20 + $0x78] sm:$0xff] }
 0x7b6   :  { %2317 = vmatmul.mubr.f32.vlgmr.msra.gmra.mrb[10].mxu0 %v1328_v37  ;;  %v1715_v37 = vld [vmem:[#allocation22 + $0x10] sm:$0xff] }
 0x7b7   :  { %2761 = vmatpush3.bf16.msra.mxu0 %v2760_v34  ;;  %2327 = vmatprep.mubr.msk.f32.mxu0 %vm3226_vm4, %v3227_v43 }
 0x7b8   :  { %2762 = vmatprep.subr.bf16.mxu0 %v3224_v0 }
 0x7bb   :  { %2764 = vmatpush3.bf16.msra.mxu0 %v2763_v38  ;;  %v2814_v38 = vpack.c.bf16 %v1714_v36, %v1713_v35 }
 0x7bc   :  { %2789 = vmatprep.subr.bf16.mxu0 %v3224_v0 }
 0x7be   :  { %2328 = vmatmul.mubr.msk.f32.vlgmr.msra.gmra.mrb[12].mxu0 %vm1435_vm14, %v1423_v39  ;;  %v1716_v39 = vld [vmem:[#allocation22 + $0x18] sm:$0xff] }
 0x7bf   :  { %2397 = vmatprep.mubr.msk.f32.mxu0 %vm3226_vm4, %v3227_v43  ;;  %2791 = vmatpush3.bf16.msra.mxu0 %v2790_v1  ;;  %v2817_v40 = vpack.c.bf16 %v1716_v39, %v1715_v37  ;;  %v2832_v1 = vpack.c.bf16 %v1726_v63, %v1725_v61 }
 0x7c0   :  { %2792 = vmatprep.subr.bf16.mxu0 %v3224_v0 }
 0x7c3   :  { %2794 = vmatpush3.bf16.msra.mxu0 %v2793_v3  ;;  %v1728_v3 = vld [vmem:[#allocation22 + $0x78] sm:$0xff] }
 0x7c4   :  { %2795 = vmatprep.subr.bf16.mxu0 %v3224_v0  ;;  %v2835_v5 = vpack.c.bf16 %v1728_v3, %v1727_v2 }
 0x7c7   :  { %2797 = vmatpush3.bf16.msra.mxu0 %v2796_v9 }
 0x7c8   :  { %2798 = vmatprep.subr.bf16.mxu0 %v3224_v0 }
 0x7cb   :  { %2800 = vmatpush3.bf16.msra.mxu0 %v2799_v23 }
 0x7cc   :  { %2801 = vmatprep.subr.bf16.mxu0 %v3224_v0 }
 0x7cf   :  { %2803 = vmatpush3.bf16.msra.mxu0 %v2802_v26 }
 0x7d0   :  { %2804 = vmatprep.subr.bf16.mxu0 %v3224_v0 }
 0x7d3   :  { %2806 = vmatpush3.bf16.msra.mxu0 %v2805_v30 }
 0x7d4   :  { %2807 = vmatprep.subr.bf16.mxu0 %v3224_v0 }
 0x7d7   :  { %2809 = vmatpush3.bf16.msra.mxu0 %v2808_v32 }
 0x7d8   :  { %2810 = vmatprep.subr.bf16.mxu0 %v3224_v0 }
 0x889   :  { %v1418_v8 = vpop.f32.mrb[10].mxu0 }
 0x88a   :  { %v1419_v10 = vadd.f32 %v1855_v7, %v1418_v8  ;;  %v2318_v11 = vpop.f32.mrb[11].mxu0 }
 0x88c   :  { %1422 = vst [vmem:[#allocation23] sm:$0x3] %v1419_v10 }
 0x891   :  { %v1505_v13 = vpop.f32.mrb[12].mxu0 }
 0x892   :  { %v1506_v14 = vadd.f32 %v1856_v12, %v1505_v13  ;;  %v2329_v15 = vpop.f32.mrb[13].mxu0 }
 0x894   :  { %v1510_v16 = vmin.f32 %v1506_v14, 0.0  ;;  %vm1509_vm15 = vcmp.gt.f32.partialorder %v1506_v14, 0.0 }
 0x896   :  { %v1511_v17 = vmul.f32 1.442695, %v1510_v16 }
 0x898   :  { %2877 = vpow2.f32 %v1511_v17 }
 0x8a2   :  { %v2878_v18 = vpop.eup %2877 }
 0x8a3   :  { %v1858_v19 = vadd.f32 -1.0, %v2878_v18 }
 0x8a5   :  { %v1514_v20 = vsel %vm1509_vm15, %v1506_v14, %v1858_v19 }
 0x8a6   :  { %2363 = vmatmul.mubr.f32.vlgmr.msra.gmra.mrb[10].mxu1 %v1514_v20 }
 0x8a7   :  { %2432 = vmatprep.mubr.msk.f32.mxu1 %vm3226_vm4, %v3227_v43  ;;  %v1628_v43 = vld [vmem:[#allocation20 + $0x70] sm:$0xff]  ;;  %2815 = vmatpush3.bf16.msra.mxu1 %v2814_v38 }
 0x8a8   :  { %v2811_v34 = vpack.c.bf16 %v1629_v33, %v1628_v43  ;;  %2816 = vmatprep.subr.bf16.mxu1 %v3224_v0 }
 0x8aa   :  { %2812 = vmatpush3.bf16.msra.mxu0 %v2811_v34 }
 0x8ab   :  { %2818 = vmatpush3.bf16.msra.mxu1 %v2817_v40 }
 0x8ac   :  { %2819 = vmatprep.subr.bf16.mxu1 %v3224_v0 }
 0x8af   :  { %2821 = vmatpush3.bf16.msra.mxu1 %v2820_v44 }
 0x8b0   :  { %2822 = vmatprep.subr.bf16.mxu1 %v3224_v0 }
 0x8b3   :  { %2824 = vmatpush3.bf16.msra.mxu1 %v2823_v56 }
 0x8b4   :  { %2825 = vmatprep.subr.bf16.mxu1 %v3224_v0 }
 0x8b7   :  { %2827 = vmatpush3.bf16.msra.mxu1 %v2826_v58 }
 0x8b8   :  { %2828 = vmatprep.subr.bf16.mxu1 %v3224_v0 }
 0x8bb   :  { %2830 = vmatpush3.bf16.msra.mxu1 %v2829_v62 }
 0x8bc   :  { %2831 = vmatprep.subr.bf16.mxu1 %v3224_v0 }
 0x8bf   :  { %2833 = vmatpush3.bf16.msra.mxu1 %v2832_v1 }
 0x8c0   :  { %2834 = vmatprep.subr.bf16.mxu1 %v3224_v0 }
 0x8c3   :  { %2836 = vmatpush3.bf16.msra.mxu1 %v2835_v5 }
 0x979   :  { %v1604_v47 = vpop.f32.mrb[10].mxu1 }
 0x97a   :  { %v1605_v48 = vadd.f32 %v1859_v45, %v1604_v47  ;;  %v2364_v49 = vpop.f32.mrb[11].mxu1 }
 0x97c   :  { %v1609_v50 = vmin.f32 %v1605_v48, 0.0  ;;  %vm1608_vm0 = vcmp.gt.f32.partialorder %v1605_v48, 0.0 }
 0x97e   :  { %v1610_v51 = vmul.f32 1.442695, %v1609_v50 }
 0x980   :  { %2879 = vpow2.f32 %v1610_v51 }
 0x98a   :  { %v2880_v46 = vpop.eup %2879 }
 0x98b   :  { %v1860_v52 = vadd.f32 -1.0, %v2880_v46 }
 0x98d   :  { %v1613_v53 = vsel %vm1608_vm0, %v1605_v48, %v1860_v52 }
 0x98e   :  { %2398 = vmatmul.mubr.f32.vlgmr.msra.gmra.mrb[14].mxu0 %v1613_v53 }
 0xa61   :  { %v1703_v9 = vpop.f32.mrb[14].mxu0 }
 0xa62   :  { %v1704_v7 = vadd.f32 %v1861_v6, %v1703_v9  ;;  %v2399_v8 = vpop.f32.mrb[15].mxu0 }
 0xa64   :  { %v1708_v10 = vmin.f32 %v1704_v7, 0.0  ;;  %vm1707_vm1 = vcmp.gt.f32.partialorder %v1704_v7, 0.0 }
 0xa66   :  { %v1709_v11 = vmul.f32 1.442695, %v1708_v10 }
 0xa68   :  { %2881 = vpow2.f32 %v1709_v11 }
 0xa72   :  { %v2882_v12 = vpop.eup %2881 }
 0xa73   :  { %v1862_v13 = vadd.f32 -1.0, %v2882_v12 }
 0xa75   :  { %v1712_v14 = vsel %vm1707_vm1, %v1704_v7, %v1862_v13 }
 0xa76   :  { %2433 = vmatmul.mubr.f32.vlgmr.msra.gmra.mrb[12].mxu1 %v1712_v14 }
 0xa77   :  { %3180 = shalt.err (!%p3177_p10)
}
 0xa78   :  { %s3852_s6 = sld [smem:[#allocation46_spill]] }
 0xa7e   :  { %s3181_s8 = scalar_lea.hbm %s3852_s6, 32 }
 0xa7f   :  { %p3182_p11 = scmp.ne.s32.totalorder %s3852_s6, %s3181_s8  ;;  %p3185_p12 = scmp.lt.u32.totalorder %s3181_s8, %s3852_s6 }
 0xa81   :  { %p3187_p13 = pnand %p3185_p12, %p3182_p11 }
 0xa83   :  { %3190 = shalt.err (!%p3187_p13)
}
 0xa84   :  { %1816 = dma.vmem_to_hbm [thread:$0]  %s1814_s30, 32, %s3852_s6, [#allocation4]  }
 0xa85   :  { %s3853_s3 = sld [smem:[#allocation45_spill]]  ;;  %s3854_s2 = sld [smem:[#allocation47_spill]] }
 0xa8b   :  { %v1863_v0 = vld [vmem:[%s3853_s3] ss:$0 sm:$0xff] }
 0xb49   :  { %v1802_v15 = vpop.f32.mrb[12].mxu1 }
 0xb4a   :  { %v1803_v16 = vadd.f32 %v1863_v0, %v1802_v15  ;;  %v2434_v17 = vpop.f32.mrb[13].mxu1 }
 0xb4c   :  { %1806 = vst [vmem:[%s3854_s2] sm:$0x3] %v1803_v16 }
 0xb4d   :  { %3205 = dma.done.wait [#allocation4], 32  }
 0xb4e   :  { %3206 = vsyncadd [#allocation4], 4294967264 }
 0xb4f   :  { %1824 = vsyncpa [#allocation3], 1 }
 0xb50   :  { %1825 = vsyncpa [#allocation6], 1 }
 0xb51   :  { %1826 = vsyncpa [#allocation9], 1 }
 0xb52   :  { %1827 = vsyncpa [#allocation12], 1 }
 0xb53   :  { %1828 = vsyncpa [#allocation15], 1 }
 0xb54   :  { %1829 = vsyncpa [#allocation18], 1 }
 0xb55   :  { %1830 = vsyncpa [#allocation21], 1 }
 0xb56   :  { %1831 = vsyncpa [#allocation4], 1 }

</bundles_post_ra>
